<compile_context>
chip_gen: v7x
topology: tpu7x:2x2x1
jax: 0.10.0
libtpu: 0.0.40
codegen_flags: <defaults>
</compile_context>

<pallas_src>
import math

import jax
import jax.numpy as jnp
from jax.experimental import pallas as pl
from jax.experimental.pallas import tpu as pltpu

# ----- small synthetic Electra config -----
VOCAB = 100
TYPE_VOCAB = 2
MAX_POS = 32
HIDDEN = 32
N_LAYERS = 2
N_HEADS = 4
HEAD_DIM = HIDDEN // N_HEADS
INTER = 64
LN_EPS = 1e-12

BATCH = 2
SEQ = 8


def _layernorm(x, g, b):
    mu = jnp.mean(x, axis=-1, keepdims=True)
    var = jnp.mean((x - mu) ** 2, axis=-1, keepdims=True)
    return (x - mu) * jax.lax.rsqrt(var + LN_EPS) * g + b


def _gelu(x):
    # TODO(synk): HF "gelu" is erf-based; using the tanh approximation to keep
    # the Mosaic lowering dependency-free (difference ~1e-3).
    c = math.sqrt(2.0 / math.pi)
    return 0.5 * x * (1.0 + jnp.tanh(c * (x + 0.044715 * x * x * x)))


def electra_kernel(emb_ref, bias_ref, pool_w_ref,
                   emb_ln_g_ref, emb_ln_b_ref,
                   wqkv_ref, bqkv_ref, wo_ref, bo_ref,
                   ln1_g_ref, ln1_b_ref,
                   wi_ref, bi_ref, wo2_ref, bo2_ref,
                   ln2_g_ref, ln2_b_ref,
                   pooled_ref,
                   ctx_ref):
    scale = 1.0 / math.sqrt(HEAD_DIM)

    # Embedding LayerNorm over the whole (B*S, H) slab at once.
    x = _layernorm(emb_ref[...], emb_ln_g_ref[...], emb_ln_b_ref[...])   # (BS, H) f32

    # Precomputed additive attention bias (B*S, B*S):
    #   0      where query/key belong to the same batch element AND key is valid
    #   -1e9   otherwise (cross-batch or padded key)
    # Every batch element has >= 1 valid key, so no softmax row is fully masked
    # (padded query rows produce finite garbage that pooling later zeroes out).
    bias = bias_ref[...]

    for l in range(N_LAYERS):                                  # static unroll
        # ---- fused QKV projection: one (BS, H) @ (H, 3H) matmul ----
        qkv = jnp.dot(x.astype(jnp.bfloat16), wqkv_ref[l],
                      preferred_element_type=jnp.float32) + bqkv_ref[l]   # (BS, 3H) f32
        qkv_b = qkv.astype(jnp.bfloat16)

        # ---- per-head attention; contexts written to VMEM scratch at static
        #      lane offsets (no concatenate) ----
        for h in range(N_HEADS):                               # static unroll
            lo = h * HEAD_DIM
            qh = qkv_b[:, lo:lo + HEAD_DIM]                            # (BS, hd)
            kh = qkv_b[:, HIDDEN + lo:HIDDEN + lo + HEAD_DIM]          # (BS, hd)
            vh = qkv_b[:, 2 * HIDDEN + lo:2 * HIDDEN + lo + HEAD_DIM]  # (BS, hd)

            # scores = qh @ kh.T without an explicit transpose
            s = jax.lax.dot_general(qh, kh, (((1,), (1,)), ((), ())),
                                    preferred_element_type=jnp.float32)
            s = s * scale + bias                                       # (BS, BS)
            s = s - jnp.max(s, axis=-1, keepdims=True)
            p = jnp.exp(s)
            p = p * pl.reciprocal(jnp.sum(p, axis=-1, keepdims=True),
                                  approx=True)                         # softmax
            ctx_ref[:, lo:lo + HEAD_DIM] = jnp.dot(
                p.astype(jnp.bfloat16), vh, preferred_element_type=jnp.float32)

        # ---- attention output projection + residual LayerNorm ----
        attn_out = jnp.dot(ctx_ref[...].astype(jnp.bfloat16), wo_ref[l],
                           preferred_element_type=jnp.float32) + bo_ref[l]
        x = _layernorm(x + attn_out, ln1_g_ref[l], ln1_b_ref[l])

        # ---- GELU FFN + residual LayerNorm ----
        inter = _gelu(jnp.dot(x.astype(jnp.bfloat16), wi_ref[l],
                              preferred_element_type=jnp.float32) + bi_ref[l])
        ffn_out = jnp.dot(inter.astype(jnp.bfloat16), wo2_ref[l],
                          preferred_element_type=jnp.float32) + bo2_ref[l]
        x = _layernorm(x + ffn_out, ln2_g_ref[l], ln2_b_ref[l])

    # ---- masked mean pooling as a single matmul; one consolidated store ----
    # pool_w[b, b*S+t] = mask[b,t] / clamp(sum_t mask[b,t], 1e-9); 0 elsewhere.
    pooled_ref[...] = jnp.dot(pool_w_ref[...], x,
                              preferred_element_type=jnp.float32)


def init_params(key):
    def normal(k, shape):
        return 0.02 * jax.random.normal(k, shape, dtype=jnp.float32)

    ks = jax.random.split(key, 16)
    p = {
        "word_emb": normal(ks[0], (VOCAB, HIDDEN)),
        "pos_emb": normal(ks[1], (MAX_POS, HIDDEN)),
        "type_emb": normal(ks[2], (TYPE_VOCAB, HIDDEN)),
        "emb_ln_g": jnp.ones((1, HIDDEN), jnp.float32),
        "emb_ln_b": jnp.zeros((1, HIDDEN), jnp.float32),
        # fused Q|K|V projection
        "wqkv": normal(ks[3], (N_LAYERS, HIDDEN, 3 * HIDDEN)),
        "bqkv": jnp.zeros((N_LAYERS, 1, 3 * HIDDEN), jnp.float32),
        "wo": normal(ks[6], (N_LAYERS, HIDDEN, HIDDEN)),
        "bo": jnp.zeros((N_LAYERS, 1, HIDDEN), jnp.float32),
        "ln1_g": jnp.ones((N_LAYERS, 1, HIDDEN), jnp.float32),
        "ln1_b": jnp.zeros((N_LAYERS, 1, HIDDEN), jnp.float32),
        "wi": normal(ks[7], (N_LAYERS, HIDDEN, INTER)),
        "bi": jnp.zeros((N_LAYERS, 1, INTER), jnp.float32),
        "wo2": normal(ks[8], (N_LAYERS, INTER, HIDDEN)),
        "bo2": jnp.zeros((N_LAYERS, 1, HIDDEN), jnp.float32),
        "ln2_g": jnp.ones((N_LAYERS, 1, HIDDEN), jnp.float32),
        "ln2_b": jnp.zeros((N_LAYERS, 1, HIDDEN), jnp.float32),
    }
    return p


def electra_encoder(input_ids, attention_mask, token_type_ids, params):
    B, S = input_ids.shape
    BS = B * S

    # ----- glue: embedding gathers + mask precomputation in plain JAX -----
    emb = (params["word_emb"][input_ids]
           + params["pos_emb"][:S][None, :, :]
           + params["type_emb"][token_type_ids]).reshape(BS, HIDDEN)   # (BS, H)

    mask_f = attention_mask.astype(jnp.float32)                        # (B, S)
    batch_ids = jnp.repeat(jnp.arange(B), S)                           # (BS,)
    same_batch = batch_ids[:, None] == batch_ids[None, :]              # (BS, BS)
    key_valid = mask_f.reshape(BS) > 0.5                               # (BS,)
    attn_bias = jnp.where(same_batch & key_valid[None, :], 0.0,
                          -1e9).astype(jnp.float32)                    # (BS, BS)

    # masked-mean pooling weights: pool_w @ hidden == mean_embeddings
    denom = jnp.maximum(mask_f.sum(axis=1, keepdims=True), 1e-9)       # (B, 1)
    token_w = (mask_f / denom).reshape(BS)                             # (BS,)
    sel = (batch_ids[None, :] == jnp.arange(B)[:, None]).astype(jnp.float32)
    pool_w = sel * token_w[None, :]                                    # (B, BS)

    bf16 = jnp.bfloat16
    args = (emb, attn_bias, pool_w,
            params["emb_ln_g"], params["emb_ln_b"],
            params["wqkv"].astype(bf16), params["bqkv"],
            params["wo"].astype(bf16), params["bo"],
            params["ln1_g"], params["ln1_b"],
            params["wi"].astype(bf16), params["bi"],
            params["wo2"].astype(bf16), params["bo2"],
            params["ln2_g"], params["ln2_b"])

    vmem = pltpu.MemorySpace.VMEM
    return pl.pallas_call(
        electra_kernel,
        out_shape=jax.ShapeDtypeStruct((B, HIDDEN), jnp.float32),
        in_specs=[pl.BlockSpec(memory_space=vmem)] * len(args),
        out_specs=pl.BlockSpec(memory_space=vmem),
        scratch_shapes=[pltpu.VMEM((BS, HIDDEN), jnp.float32)],   # per-layer ctx
    )(*args)


if __name__ == "__main__":
    key = jax.random.PRNGKey(0)
    kp, kid = jax.random.split(key)
    params = init_params(kp)

    input_ids = jax.random.randint(kid, (BATCH, SEQ), 0, VOCAB, dtype=jnp.int32)
    # batch 0: full length, batch 1: 5 valid tokens then padding
    lengths = jnp.array([SEQ, 5], dtype=jnp.int32)
    attention_mask = (jnp.arange(SEQ)[None, :] < lengths[:, None]).astype(jnp.int32)
    token_type_ids = jnp.zeros((BATCH, SEQ), dtype=jnp.int32)

    mean_embeddings = electra_encoder(input_ids, attention_mask,
                                      token_type_ids, params)
    jax.block_until_ready(mean_embeddings)
    assert mean_embeddings.shape == (BATCH, HIDDEN)
    assert bool(jnp.all(jnp.isfinite(mean_embeddings)))
    print("KERNEL_OK")
</pallas_src>

<mosaic_0001>
module attributes {stable_mosaic.version = 11 : i64} {
  func.func @electra_kernel(%arg0: memref<16x32xf32, #tpu.memory_space<vmem>>, %arg1: memref<16x16xf32, #tpu.memory_space<vmem>>, %arg2: memref<2x16xf32, #tpu.memory_space<vmem>>, %arg3: memref<1x32xf32, #tpu.memory_space<vmem>>, %arg4: memref<1x32xf32, #tpu.memory_space<vmem>>, %arg5: memref<2x32x96xbf16, #tpu.memory_space<vmem>>, %arg6: memref<2x1x96xf32, #tpu.memory_space<vmem>>, %arg7: memref<2x32x32xbf16, #tpu.memory_space<vmem>>, %arg8: memref<2x1x32xf32, #tpu.memory_space<vmem>>, %arg9: memref<2x1x32xf32, #tpu.memory_space<vmem>>, %arg10: memref<2x1x32xf32, #tpu.memory_space<vmem>>, %arg11: memref<2x32x64xbf16, #tpu.memory_space<vmem>>, %arg12: memref<2x1x64xf32, #tpu.memory_space<vmem>>, %arg13: memref<2x64x32xbf16, #tpu.memory_space<vmem>>, %arg14: memref<2x1x32xf32, #tpu.memory_space<vmem>>, %arg15: memref<2x1x32xf32, #tpu.memory_space<vmem>>, %arg16: memref<2x1x32xf32, #tpu.memory_space<vmem>>, %arg17: memref<2x32xf32, #tpu.memory_space<vmem>>, %arg18: memref<16x32xf32, #tpu.memory_space<vmem>>) attributes {dimension_semantics = [], scalar_prefetch = 0 : i64, scratch_operands = 1 : i64, tpu.core_type = #tpu.core_type<tc>} {
    %c0 = arith.constant 0 : index
    %c0_0 = arith.constant 0 : index
    %0 = vector.load %arg0[%c0, %c0_0] : memref<16x32xf32, #tpu.memory_space<vmem>>, vector<16x32xf32>
    %c0_1 = arith.constant 0 : index
    %c0_2 = arith.constant 0 : index
    %1 = vector.load %arg3[%c0_1, %c0_2] : memref<1x32xf32, #tpu.memory_space<vmem>>, vector<1x32xf32>
    %c0_3 = arith.constant 0 : index
    %c0_4 = arith.constant 0 : index
    %2 = vector.load %arg4[%c0_3, %c0_4] : memref<1x32xf32, #tpu.memory_space<vmem>>, vector<1x32xf32>
    %cst = arith.constant dense<0.000000e+00> : vector<16xf32>
    %3 = vector.multi_reduction <add>, %0, %cst [1] : vector<16x32xf32> to vector<16xf32>
    %4 = vector.shape_cast %3 : vector<16xf32> to vector<16x1xf32>
    %cst_5 = arith.constant 3.200000e+01 : f32
    %5 = vector.broadcast %cst_5 : f32 to vector<16x1xf32>
    %6 = arith.divf %4, %5 : vector<16x1xf32>
    %7 = vector.broadcast %6 : vector<16x1xf32> to vector<16x32xf32>
    %8 = arith.subf %0, %7 : vector<16x32xf32>
    %9 = arith.mulf %8, %8 : vector<16x32xf32>
    %cst_6 = arith.constant dense<0.000000e+00> : vector<16xf32>
    %10 = vector.multi_reduction <add>, %9, %cst_6 [1] : vector<16x32xf32> to vector<16xf32>
    %11 = vector.shape_cast %10 : vector<16xf32> to vector<16x1xf32>
    %cst_7 = arith.constant 3.200000e+01 : f32
    %12 = vector.broadcast %cst_7 : f32 to vector<16x1xf32>
    %13 = arith.divf %11, %12 : vector<16x1xf32>
    %14 = vector.broadcast %6 : vector<16x1xf32> to vector<16x32xf32>
    %15 = arith.subf %0, %14 : vector<16x32xf32>
    %cst_8 = arith.constant 9.99999996E-13 : f32
    %16 = vector.broadcast %cst_8 : f32 to vector<16x1xf32>
    %17 = arith.addf %13, %16 : vector<16x1xf32>
    %18 = math.rsqrt %17 : vector<16x1xf32>
    %19 = vector.broadcast %18 : vector<16x1xf32> to vector<16x32xf32>
    %20 = arith.mulf %15, %19 : vector<16x32xf32>
    %21 = vector.broadcast %1 : vector<1x32xf32> to vector<16x32xf32>
    %22 = arith.mulf %20, %21 : vector<16x32xf32>
    %23 = vector.broadcast %2 : vector<1x32xf32> to vector<16x32xf32>
    %24 = arith.addf %22, %23 : vector<16x32xf32>
    %c0_9 = arith.constant 0 : index
    %c0_10 = arith.constant 0 : index
    %25 = vector.load %arg1[%c0_9, %c0_10] : memref<16x16xf32, #tpu.memory_space<vmem>>, vector<16x16xf32>
    %26 = arith.truncf %24 : vector<16x32xf32> to vector<16x32xbf16>
    %c0_11 = arith.constant 0 : index
    %c0_12 = arith.constant 0 : index
    %c0_13 = arith.constant 0 : index
    %27 = vector.load %arg5[%c0_11, %c0_12, %c0_13] : memref<2x32x96xbf16, #tpu.memory_space<vmem>>, vector<1x32x96xbf16>
    %28 = vector.shape_cast %27 : vector<1x32x96xbf16> to vector<32x96xbf16>
    %cst_14 = arith.constant dense<0.000000e+00> : vector<16x96xf32>
    %29 = tpu.matmul %26, %28, %cst_14 {dimension_numbers = #tpu.dot_dimension_numbers<[1], [0], [0], [1], [0, 0, 1, 1], [], []>} : vector<16x32xbf16>, vector<32x96xbf16>, vector<16x96xf32> -> vector<16x96xf32>
    %c0_15 = arith.constant 0 : index
    %c0_16 = arith.constant 0 : index
    %c0_17 = arith.constant 0 : index
    %30 = vector.load %arg6[%c0_15, %c0_16, %c0_17] : memref<2x1x96xf32, #tpu.memory_space<vmem>>, vector<1x1x96xf32>
    %31 = vector.shape_cast %30 : vector<1x1x96xf32> to vector<1x96xf32>
    %32 = vector.broadcast %31 : vector<1x96xf32> to vector<16x96xf32>
    %33 = arith.addf %29, %32 : vector<16x96xf32>
    %34 = arith.truncf %33 : vector<16x96xf32> to vector<16x96xbf16>
    %35 = vector.extract_strided_slice %34 {offsets = [0, 0], sizes = [16, 8], strides = [1, 1]} : vector<16x96xbf16> to vector<16x8xbf16>
    %36 = vector.extract_strided_slice %34 {offsets = [0, 32], sizes = [16, 8], strides = [1, 1]} : vector<16x96xbf16> to vector<16x8xbf16>
    %37 = vector.extract_strided_slice %34 {offsets = [0, 64], sizes = [16, 8], strides = [1, 1]} : vector<16x96xbf16> to vector<16x8xbf16>
    %cst_18 = arith.constant dense<0.000000e+00> : vector<16x16xf32>
    %38 = tpu.matmul %35, %36, %cst_18 {dimension_numbers = #tpu.dot_dimension_numbers<[1], [1], [0], [0], [0, 0, 1, 0], [], []>} : vector<16x8xbf16>, vector<16x8xbf16>, vector<16x16xf32> -> vector<16x16xf32>
    %cst_19 = arith.constant 0.353553385 : f32
    %39 = vector.broadcast %cst_19 : f32 to vector<16x16xf32>
    %40 = arith.mulf %38, %39 : vector<16x16xf32>
    %41 = arith.addf %40, %25 : vector<16x16xf32>
    %cst_20 = arith.constant dense<0xFF800000> : vector<16xf32>
    %42 = vector.multi_reduction <maximumf>, %41, %cst_20 [1] : vector<16x16xf32> to vector<16xf32>
    %43 = vector.shape_cast %42 : vector<16xf32> to vector<16x1xf32>
    %44 = vector.broadcast %43 : vector<16x1xf32> to vector<16x16xf32>
    %45 = arith.subf %41, %44 : vector<16x16xf32>
    %46 = math.exp %45 : vector<16x16xf32>
    %cst_21 = arith.constant dense<0.000000e+00> : vector<16xf32>
    %47 = vector.multi_reduction <add>, %46, %cst_21 [1] : vector<16x16xf32> to vector<16xf32>
    %48 = vector.shape_cast %47 : vector<16xf32> to vector<16x1xf32>
    %49 = tpu.reciprocal %48 {approx = true} : vector<16x1xf32> -> vector<16x1xf32>
    %50 = vector.broadcast %49 : vector<16x1xf32> to vector<16x16xf32>
    %51 = arith.mulf %46, %50 : vector<16x16xf32>
    %52 = arith.truncf %51 : vector<16x16xf32> to vector<16x16xbf16>
    %cst_22 = arith.constant dense<0.000000e+00> : vector<16x8xf32>
    %53 = tpu.matmul %52, %37, %cst_22 {dimension_numbers = #tpu.dot_dimension_numbers<[1], [0], [0], [1], [0, 0, 1, 1], [], []>} : vector<16x16xbf16>, vector<16x8xbf16>, vector<16x8xf32> -> vector<16x8xf32>
    %c0_23 = arith.constant 0 : index
    %c0_24 = arith.constant 0 : index
    %54 = vector.load %arg18[%c0_23, %c0_24] : memref<16x32xf32, #tpu.memory_space<vmem>>, vector<16x8xf32>
    tpu.vector_store %arg18[%c0_23, %c0_24], %53 {strides = array<i32>} : memref<16x32xf32, #tpu.memory_space<vmem>>, vector<16x8xf32>,
    %55 = vector.extract_strided_slice %34 {offsets = [0, 8], sizes = [16, 8], strides = [1, 1]} : vector<16x96xbf16> to vector<16x8xbf16>
    %56 = vector.extract_strided_slice %34 {offsets = [0, 40], sizes = [16, 8], strides = [1, 1]} : vector<16x96xbf16> to vector<16x8xbf16>
    %57 = vector.extract_strided_slice %34 {offsets = [0, 72], sizes = [16, 8], strides = [1, 1]} : vector<16x96xbf16> to vector<16x8xbf16>
    %cst_25 = arith.constant dense<0.000000e+00> : vector<16x16xf32>
    %58 = tpu.matmul %55, %56, %cst_25 {dimension_numbers = #tpu.dot_dimension_numbers<[1], [1], [0], [0], [0, 0, 1, 0], [], []>} : vector<16x8xbf16>, vector<16x8xbf16>, vector<16x16xf32> -> vector<16x16xf32>
    %cst_26 = arith.constant 0.353553385 : f32
    %59 = vector.broadcast %cst_26 : f32 to vector<16x16xf32>
    %60 = arith.mulf %58, %59 : vector<16x16xf32>
    %61 = arith.addf %60, %25 : vector<16x16xf32>
    %cst_27 = arith.constant dense<0xFF800000> : vector<16xf32>
    %62 = vector.multi_reduction <maximumf>, %61, %cst_27 [1] : vector<16x16xf32> to vector<16xf32>
    %63 = vector.shape_cast %62 : vector<16xf32> to vector<16x1xf32>
    %64 = vector.broadcast %63 : vector<16x1xf32> to vector<16x16xf32>
    %65 = arith.subf %61, %64 : vector<16x16xf32>
    %66 = math.exp %65 : vector<16x16xf32>
    %cst_28 = arith.constant dense<0.000000e+00> : vector<16xf32>
    %67 = vector.multi_reduction <add>, %66, %cst_28 [1] : vector<16x16xf32> to vector<16xf32>
    %68 = vector.shape_cast %67 : vector<16xf32> to vector<16x1xf32>
    %69 = tpu.reciprocal %68 {approx = true} : vector<16x1xf32> -> vector<16x1xf32>
    %70 = vector.broadcast %69 : vector<16x1xf32> to vector<16x16xf32>
    %71 = arith.mulf %66, %70 : vector<16x16xf32>
    %72 = arith.truncf %71 : vector<16x16xf32> to vector<16x16xbf16>
    %cst_29 = arith.constant dense<0.000000e+00> : vector<16x8xf32>
    %73 = tpu.matmul %72, %57, %cst_29 {dimension_numbers = #tpu.dot_dimension_numbers<[1], [0], [0], [1], [0, 0, 1, 1], [], []>} : vector<16x16xbf16>, vector<16x8xbf16>, vector<16x8xf32> -> vector<16x8xf32>
    %c0_30 = arith.constant 0 : index
    %c8 = arith.constant 8 : index
    %74 = vector.load %arg18[%c0_30, %c8] : memref<16x32xf32, #tpu.memory_space<vmem>>, vector<16x8xf32>
    tpu.vector_store %arg18[%c0_30, %c8], %73 {strides = array<i32>} : memref<16x32xf32, #tpu.memory_space<vmem>>, vector<16x8xf32>,
    %75 = vector.extract_strided_slice %34 {offsets = [0, 16], sizes = [16, 8], strides = [1, 1]} : vector<16x96xbf16> to vector<16x8xbf16>
    %76 = vector.extract_strided_slice %34 {offsets = [0, 48], sizes = [16, 8], strides = [1, 1]} : vector<16x96xbf16> to vector<16x8xbf16>
    %77 = vector.extract_strided_slice %34 {offsets = [0, 80], sizes = [16, 8], strides = [1, 1]} : vector<16x96xbf16> to vector<16x8xbf16>
    %cst_31 = arith.constant dense<0.000000e+00> : vector<16x16xf32>
    %78 = tpu.matmul %75, %76, %cst_31 {dimension_numbers = #tpu.dot_dimension_numbers<[1], [1], [0], [0], [0, 0, 1, 0], [], []>} : vector<16x8xbf16>, vector<16x8xbf16>, vector<16x16xf32> -> vector<16x16xf32>
    %cst_32 = arith.constant 0.353553385 : f32
    %79 = vector.broadcast %cst_32 : f32 to vector<16x16xf32>
    %80 = arith.mulf %78, %79 : vector<16x16xf32>
    %81 = arith.addf %80, %25 : vector<16x16xf32>
    %cst_33 = arith.constant dense<0xFF800000> : vector<16xf32>
    %82 = vector.multi_reduction <maximumf>, %81, %cst_33 [1] : vector<16x16xf32> to vector<16xf32>
    %83 = vector.shape_cast %82 : vector<16xf32> to vector<16x1xf32>
    %84 = vector.broadcast %83 : vector<16x1xf32> to vector<16x16xf32>
    %85 = arith.subf %81, %84 : vector<16x16xf32>
    %86 = math.exp %85 : vector<16x16xf32>
    %cst_34 = arith.constant dense<0.000000e+00> : vector<16xf32>
    %87 = vector.multi_reduction <add>, %86, %cst_34 [1] : vector<16x16xf32> to vector<16xf32>
    %88 = vector.shape_cast %87 : vector<16xf32> to vector<16x1xf32>
    %89 = tpu.reciprocal %88 {approx = true} : vector<16x1xf32> -> vector<16x1xf32>
    %90 = vector.broadcast %89 : vector<16x1xf32> to vector<16x16xf32>
    %91 = arith.mulf %86, %90 : vector<16x16xf32>
    %92 = arith.truncf %91 : vector<16x16xf32> to vector<16x16xbf16>
    %cst_35 = arith.constant dense<0.000000e+00> : vector<16x8xf32>
    %93 = tpu.matmul %92, %77, %cst_35 {dimension_numbers = #tpu.dot_dimension_numbers<[1], [0], [0], [1], [0, 0, 1, 1], [], []>} : vector<16x16xbf16>, vector<16x8xbf16>, vector<16x8xf32> -> vector<16x8xf32>
    %c0_36 = arith.constant 0 : index
    %c16 = arith.constant 16 : index
    %94 = vector.load %arg18[%c0_36, %c16] : memref<16x32xf32, #tpu.memory_space<vmem>>, vector<16x8xf32>
    tpu.vector_store %arg18[%c0_36, %c16], %93 {strides = array<i32>} : memref<16x32xf32, #tpu.memory_space<vmem>>, vector<16x8xf32>,
    %95 = vector.extract_strided_slice %34 {offsets = [0, 24], sizes = [16, 8], strides = [1, 1]} : vector<16x96xbf16> to vector<16x8xbf16>
    %96 = vector.extract_strided_slice %34 {offsets = [0, 56], sizes = [16, 8], strides = [1, 1]} : vector<16x96xbf16> to vector<16x8xbf16>
    %97 = vector.extract_strided_slice %34 {offsets = [0, 88], sizes = [16, 8], strides = [1, 1]} : vector<16x96xbf16> to vector<16x8xbf16>
    %cst_37 = arith.constant dense<0.000000e+00> : vector<16x16xf32>
    %98 = tpu.matmul %95, %96, %cst_37 {dimension_numbers = #tpu.dot_dimension_numbers<[1], [1], [0], [0], [0, 0, 1, 0], [], []>} : vector<16x8xbf16>, vector<16x8xbf16>, vector<16x16xf32> -> vector<16x16xf32>
    %cst_38 = arith.constant 0.353553385 : f32
    %99 = vector.broadcast %cst_38 : f32 to vector<16x16xf32>
    %100 = arith.mulf %98, %99 : vector<16x16xf32>
    %101 = arith.addf %100, %25 : vector<16x16xf32>
    %cst_39 = arith.constant dense<0xFF800000> : vector<16xf32>
    %102 = vector.multi_reduction <maximumf>, %101, %cst_39 [1] : vector<16x16xf32> to vector<16xf32>
    %103 = vector.shape_cast %102 : vector<16xf32> to vector<16x1xf32>
    %104 = vector.broadcast %103 : vector<16x1xf32> to vector<16x16xf32>
    %105 = arith.subf %101, %104 : vector<16x16xf32>
    %106 = math.exp %105 : vector<16x16xf32>
    %cst_40 = arith.constant dense<0.000000e+00> : vector<16xf32>
    %107 = vector.multi_reduction <add>, %106, %cst_40 [1] : vector<16x16xf32> to vector<16xf32>
    %108 = vector.shape_cast %107 : vector<16xf32> to vector<16x1xf32>
    %109 = tpu.reciprocal %108 {approx = true} : vector<16x1xf32> -> vector<16x1xf32>
    %110 = vector.broadcast %109 : vector<16x1xf32> to vector<16x16xf32>
    %111 = arith.mulf %106, %110 : vector<16x16xf32>
    %112 = arith.truncf %111 : vector<16x16xf32> to vector<16x16xbf16>
    %cst_41 = arith.constant dense<0.000000e+00> : vector<16x8xf32>
    %113 = tpu.matmul %112, %97, %cst_41 {dimension_numbers = #tpu.dot_dimension_numbers<[1], [0], [0], [1], [0, 0, 1, 1], [], []>} : vector<16x16xbf16>, vector<16x8xbf16>, vector<16x8xf32> -> vector<16x8xf32>
    %c0_42 = arith.constant 0 : index
    %c24 = arith.constant 24 : index
    %114 = vector.load %arg18[%c0_42, %c24] : memref<16x32xf32, #tpu.memory_space<vmem>>, vector<16x8xf32>
    tpu.vector_store %arg18[%c0_42, %c24], %113 {strides = array<i32>} : memref<16x32xf32, #tpu.memory_space<vmem>>, vector<16x8xf32>,
    %c0_43 = arith.constant 0 : index
    %c0_44 = arith.constant 0 : index
    %115 = vector.load %arg18[%c0_43, %c0_44] : memref<16x32xf32, #tpu.memory_space<vmem>>, vector<16x32xf32>
    %116 = arith.truncf %115 : vector<16x32xf32> to vector<16x32xbf16>
    %c0_45 = arith.constant 0 : index
    %c0_46 = arith.constant 0 : index
    %c0_47 = arith.constant 0 : index
    %117 = vector.load %arg7[%c0_45, %c0_46, %c0_47] : memref<2x32x32xbf16, #tpu.memory_space<vmem>>, vector<1x32x32xbf16>
    %118 = vector.shape_cast %117 : vector<1x32x32xbf16> to vector<32x32xbf16>
    %cst_48 = arith.constant dense<0.000000e+00> : vector<16x32xf32>
    %119 = tpu.matmul %116, %118, %cst_48 {dimension_numbers = #tpu.dot_dimension_numbers<[1], [0], [0], [1], [0, 0, 1, 1], [], []>} : vector<16x32xbf16>, vector<32x32xbf16>, vector<16x32xf32> -> vector<16x32xf32>
    %c0_49 = arith.constant 0 : index
    %c0_50 = arith.constant 0 : index
    %c0_51 = arith.constant 0 : index
    %120 = vector.load %arg8[%c0_49, %c0_50, %c0_51] : memref<2x1x32xf32, #tpu.memory_space<vmem>>, vector<1x1x32xf32>
    %121 = vector.shape_cast %120 : vector<1x1x32xf32> to vector<1x32xf32>
    %122 = vector.broadcast %121 : vector<1x32xf32> to vector<16x32xf32>
    %123 = arith.addf %119, %122 : vector<16x32xf32>
    %124 = arith.addf %24, %123 : vector<16x32xf32>
    %c0_52 = arith.constant 0 : index
    %c0_53 = arith.constant 0 : index
    %c0_54 = arith.constant 0 : index
    %125 = vector.load %arg9[%c0_52, %c0_53, %c0_54] : memref<2x1x32xf32, #tpu.memory_space<vmem>>, vector<1x1x32xf32>
    %126 = vector.shape_cast %125 : vector<1x1x32xf32> to vector<1x32xf32>
    %c0_55 = arith.constant 0 : index
    %c0_56 = arith.constant 0 : index
    %c0_57 = arith.constant 0 : index
    %127 = vector.load %arg10[%c0_55, %c0_56, %c0_57] : memref<2x1x32xf32, #tpu.memory_space<vmem>>, vector<1x1x32xf32>
    %128 = vector.shape_cast %127 : vector<1x1x32xf32> to vector<1x32xf32>
    %cst_58 = arith.constant dense<0.000000e+00> : vector<16xf32>
    %129 = vector.multi_reduction <add>, %124, %cst_58 [1] : vector<16x32xf32> to vector<16xf32>
    %130 = vector.shape_cast %129 : vector<16xf32> to vector<16x1xf32>
    %cst_59 = arith.constant 3.200000e+01 : f32
    %131 = vector.broadcast %cst_59 : f32 to vector<16x1xf32>
    %132 = arith.divf %130, %131 : vector<16x1xf32>
    %133 = vector.broadcast %132 : vector<16x1xf32> to vector<16x32xf32>
    %134 = arith.subf %124, %133 : vector<16x32xf32>
    %135 = arith.mulf %134, %134 : vector<16x32xf32>
    %cst_60 = arith.constant dense<0.000000e+00> : vector<16xf32>
    %136 = vector.multi_reduction <add>, %135, %cst_60 [1] : vector<16x32xf32> to vector<16xf32>
    %137 = vector.shape_cast %136 : vector<16xf32> to vector<16x1xf32>
    %cst_61 = arith.constant 3.200000e+01 : f32
    %138 = vector.broadcast %cst_61 : f32 to vector<16x1xf32>
    %139 = arith.divf %137, %138 : vector<16x1xf32>
    %140 = vector.broadcast %132 : vector<16x1xf32> to vector<16x32xf32>
    %141 = arith.subf %124, %140 : vector<16x32xf32>
    %cst_62 = arith.constant 9.99999996E-13 : f32
    %142 = vector.broadcast %cst_62 : f32 to vector<16x1xf32>
    %143 = arith.addf %139, %142 : vector<16x1xf32>
    %144 = math.rsqrt %143 : vector<16x1xf32>
    %145 = vector.broadcast %144 : vector<16x1xf32> to vector<16x32xf32>
    %146 = arith.mulf %141, %145 : vector<16x32xf32>
    %147 = vector.broadcast %126 : vector<1x32xf32> to vector<16x32xf32>
    %148 = arith.mulf %146, %147 : vector<16x32xf32>
    %149 = vector.broadcast %128 : vector<1x32xf32> to vector<16x32xf32>
    %150 = arith.addf %148, %149 : vector<16x32xf32>
    %151 = arith.truncf %150 : vector<16x32xf32> to vector<16x32xbf16>
    %c0_63 = arith.constant 0 : index
    %c0_64 = arith.constant 0 : index
    %c0_65 = arith.constant 0 : index
    %152 = vector.load %arg11[%c0_63, %c0_64, %c0_65] : memref<2x32x64xbf16, #tpu.memory_space<vmem>>, vector<1x32x64xbf16>
    %153 = vector.shape_cast %152 : vector<1x32x64xbf16> to vector<32x64xbf16>
    %cst_66 = arith.constant dense<0.000000e+00> : vector<16x64xf32>
    %154 = tpu.matmul %151, %153, %cst_66 {dimension_numbers = #tpu.dot_dimension_numbers<[1], [0], [0], [1], [0, 0, 1, 1], [], []>} : vector<16x32xbf16>, vector<32x64xbf16>, vector<16x64xf32> -> vector<16x64xf32>
    %c0_67 = arith.constant 0 : index
    %c0_68 = arith.constant 0 : index
    %c0_69 = arith.constant 0 : index
    %155 = vector.load %arg12[%c0_67, %c0_68, %c0_69] : memref<2x1x64xf32, #tpu.memory_space<vmem>>, vector<1x1x64xf32>
    %156 = vector.shape_cast %155 : vector<1x1x64xf32> to vector<1x64xf32>
    %157 = vector.broadcast %156 : vector<1x64xf32> to vector<16x64xf32>
    %158 = arith.addf %154, %157 : vector<16x64xf32>
    %cst_70 = arith.constant 5.000000e-01 : f32
    %159 = vector.broadcast %cst_70 : f32 to vector<16x64xf32>
    %160 = arith.mulf %159, %158 : vector<16x64xf32>
    %cst_71 = arith.constant 4.471500e-02 : f32
    %161 = vector.broadcast %cst_71 : f32 to vector<16x64xf32>
    %162 = arith.mulf %161, %158 : vector<16x64xf32>
    %163 = arith.mulf %162, %158 : vector<16x64xf32>
    %164 = arith.mulf %163, %158 : vector<16x64xf32>
    %165 = arith.addf %158, %164 : vector<16x64xf32>
    %cst_72 = arith.constant 0.797884583 : f32
    %166 = vector.broadcast %cst_72 : f32 to vector<16x64xf32>
    %167 = arith.mulf %166, %165 : vector<16x64xf32>
    %168 = math.tanh %167 : vector<16x64xf32>
    %cst_73 = arith.constant 1.000000e+00 : f32
    %169 = vector.broadcast %cst_73 : f32 to vector<16x64xf32>
    %170 = arith.addf %169, %168 : vector<16x64xf32>
    %171 = arith.mulf %160, %170 : vector<16x64xf32>
    %172 = arith.truncf %171 : vector<16x64xf32> to vector<16x64xbf16>
    %c0_74 = arith.constant 0 : index
    %c0_75 = arith.constant 0 : index
    %c0_76 = arith.constant 0 : index
    %173 = vector.load %arg13[%c0_74, %c0_75, %c0_76] : memref<2x64x32xbf16, #tpu.memory_space<vmem>>, vector<1x64x32xbf16>
    %174 = vector.shape_cast %173 : vector<1x64x32xbf16> to vector<64x32xbf16>
    %cst_77 = arith.constant dense<0.000000e+00> : vector<16x32xf32>
    %175 = tpu.matmul %172, %174, %cst_77 {dimension_numbers = #tpu.dot_dimension_numbers<[1], [0], [0], [1], [0, 0, 1, 1], [], []>} : vector<16x64xbf16>, vector<64x32xbf16>, vector<16x32xf32> -> vector<16x32xf32>
    %c0_78 = arith.constant 0 : index
    %c0_79 = arith.constant 0 : index
    %c0_80 = arith.constant 0 : index
    %176 = vector.load %arg14[%c0_78, %c0_79, %c0_80] : memref<2x1x32xf32, #tpu.memory_space<vmem>>, vector<1x1x32xf32>
    %177 = vector.shape_cast %176 : vector<1x1x32xf32> to vector<1x32xf32>
    %178 = vector.broadcast %177 : vector<1x32xf32> to vector<16x32xf32>
    %179 = arith.addf %175, %178 : vector<16x32xf32>
    %180 = arith.addf %150, %179 : vector<16x32xf32>
    %c0_81 = arith.constant 0 : index
    %c0_82 = arith.constant 0 : index
    %c0_83 = arith.constant 0 : index
    %181 = vector.load %arg15[%c0_81, %c0_82, %c0_83] : memref<2x1x32xf32, #tpu.memory_space<vmem>>, vector<1x1x32xf32>
    %182 = vector.shape_cast %181 : vector<1x1x32xf32> to vector<1x32xf32>
    %c0_84 = arith.constant 0 : index
    %c0_85 = arith.constant 0 : index
    %c0_86 = arith.constant 0 : index
    %183 = vector.load %arg16[%c0_84, %c0_85, %c0_86] : memref<2x1x32xf32, #tpu.memory_space<vmem>>, vector<1x1x32xf32>
    %184 = vector.shape_cast %183 : vector<1x1x32xf32> to vector<1x32xf32>
    %cst_87 = arith.constant dense<0.000000e+00> : vector<16xf32>
    %185 = vector.multi_reduction <add>, %180, %cst_87 [1] : vector<16x32xf32> to vector<16xf32>
    %186 = vector.shape_cast %185 : vector<16xf32> to vector<16x1xf32>
    %cst_88 = arith.constant 3.200000e+01 : f32
    %187 = vector.broadcast %cst_88 : f32 to vector<16x1xf32>
    %188 = arith.divf %186, %187 : vector<16x1xf32>
    %189 = vector.broadcast %188 : vector<16x1xf32> to vector<16x32xf32>
    %190 = arith.subf %180, %189 : vector<16x32xf32>
    %191 = arith.mulf %190, %190 : vector<16x32xf32>
    %cst_89 = arith.constant dense<0.000000e+00> : vector<16xf32>
    %192 = vector.multi_reduction <add>, %191, %cst_89 [1] : vector<16x32xf32> to vector<16xf32>
    %193 = vector.shape_cast %192 : vector<16xf32> to vector<16x1xf32>
    %cst_90 = arith.constant 3.200000e+01 : f32
    %194 = vector.broadcast %cst_90 : f32 to vector<16x1xf32>
    %195 = arith.divf %193, %194 : vector<16x1xf32>
    %196 = vector.broadcast %188 : vector<16x1xf32> to vector<16x32xf32>
    %197 = arith.subf %180, %196 : vector<16x32xf32>
    %cst_91 = arith.constant 9.99999996E-13 : f32
    %198 = vector.broadcast %cst_91 : f32 to vector<16x1xf32>
    %199 = arith.addf %195, %198 : vector<16x1xf32>
    %200 = math.rsqrt %199 : vector<16x1xf32>
    %201 = vector.broadcast %200 : vector<16x1xf32> to vector<16x32xf32>
    %202 = arith.mulf %197, %201 : vector<16x32xf32>
    %203 = vector.broadcast %182 : vector<1x32xf32> to vector<16x32xf32>
    %204 = arith.mulf %202, %203 : vector<16x32xf32>
    %205 = vector.broadcast %184 : vector<1x32xf32> to vector<16x32xf32>
    %206 = arith.addf %204, %205 : vector<16x32xf32>
    %207 = arith.truncf %206 : vector<16x32xf32> to vector<16x32xbf16>
    %c1 = arith.constant 1 : index
    %c0_92 = arith.constant 0 : index
    %c0_93 = arith.constant 0 : index
    %208 = vector.load %arg5[%c1, %c0_92, %c0_93] : memref<2x32x96xbf16, #tpu.memory_space<vmem>>, vector<1x32x96xbf16>
    %209 = vector.shape_cast %208 : vector<1x32x96xbf16> to vector<32x96xbf16>
    %cst_94 = arith.constant dense<0.000000e+00> : vector<16x96xf32>
    %210 = tpu.matmul %207, %209, %cst_94 {dimension_numbers = #tpu.dot_dimension_numbers<[1], [0], [0], [1], [0, 0, 1, 1], [], []>} : vector<16x32xbf16>, vector<32x96xbf16>, vector<16x96xf32> -> vector<16x96xf32>
    %c1_95 = arith.constant 1 : index
    %c0_96 = arith.constant 0 : index
    %c0_97 = arith.constant 0 : index
    %211 = vector.load %arg6[%c1_95, %c0_96, %c0_97] : memref<2x1x96xf32, #tpu.memory_space<vmem>>, vector<1x1x96xf32>
    %212 = vector.shape_cast %211 : vector<1x1x96xf32> to vector<1x96xf32>
    %213 = vector.broadcast %212 : vector<1x96xf32> to vector<16x96xf32>
    %214 = arith.addf %210, %213 : vector<16x96xf32>
    %215 = arith.truncf %214 : vector<16x96xf32> to vector<16x96xbf16>
    %216 = vector.extract_strided_slice %215 {offsets = [0, 0], sizes = [16, 8], strides = [1, 1]} : vector<16x96xbf16> to vector<16x8xbf16>
    %217 = vector.extract_strided_slice %215 {offsets = [0, 32], sizes = [16, 8], strides = [1, 1]} : vector<16x96xbf16> to vector<16x8xbf16>
    %218 = vector.extract_strided_slice %215 {offsets = [0, 64], sizes = [16, 8], strides = [1, 1]} : vector<16x96xbf16> to vector<16x8xbf16>
    %cst_98 = arith.constant dense<0.000000e+00> : vector<16x16xf32>
    %219 = tpu.matmul %216, %217, %cst_98 {dimension_numbers = #tpu.dot_dimension_numbers<[1], [1], [0], [0], [0, 0, 1, 0], [], []>} : vector<16x8xbf16>, vector<16x8xbf16>, vector<16x16xf32> -> vector<16x16xf32>
    %cst_99 = arith.constant 0.353553385 : f32
    %220 = vector.broadcast %cst_99 : f32 to vector<16x16xf32>
    %221 = arith.mulf %219, %220 : vector<16x16xf32>
    %222 = arith.addf %221, %25 : vector<16x16xf32>
    %cst_100 = arith.constant dense<0xFF800000> : vector<16xf32>
    %223 = vector.multi_reduction <maximumf>, %222, %cst_100 [1] : vector<16x16xf32> to vector<16xf32>
    %224 = vector.shape_cast %223 : vector<16xf32> to vector<16x1xf32>
    %225 = vector.broadcast %224 : vector<16x1xf32> to vector<16x16xf32>
    %226 = arith.subf %222, %225 : vector<16x16xf32>
    %227 = math.exp %226 : vector<16x16xf32>
    %cst_101 = arith.constant dense<0.000000e+00> : vector<16xf32>
    %228 = vector.multi_reduction <add>, %227, %cst_101 [1] : vector<16x16xf32> to vector<16xf32>
    %229 = vector.shape_cast %228 : vector<16xf32> to vector<16x1xf32>
    %230 = tpu.reciprocal %229 {approx = true} : vector<16x1xf32> -> vector<16x1xf32>
    %231 = vector.broadcast %230 : vector<16x1xf32> to vector<16x16xf32>
    %232 = arith.mulf %227, %231 : vector<16x16xf32>
    %233 = arith.truncf %232 : vector<16x16xf32> to vector<16x16xbf16>
    %cst_102 = arith.constant dense<0.000000e+00> : vector<16x8xf32>
    %234 = tpu.matmul %233, %218, %cst_102 {dimension_numbers = #tpu.dot_dimension_numbers<[1], [0], [0], [1], [0, 0, 1, 1], [], []>} : vector<16x16xbf16>, vector<16x8xbf16>, vector<16x8xf32> -> vector<16x8xf32>
    %c0_103 = arith.constant 0 : index
    %c0_104 = arith.constant 0 : index
    %235 = vector.load %arg18[%c0_103, %c0_104] : memref<16x32xf32, #tpu.memory_space<vmem>>, vector<16x8xf32>
    tpu.vector_store %arg18[%c0_103, %c0_104], %234 {strides = array<i32>} : memref<16x32xf32, #tpu.memory_space<vmem>>, vector<16x8xf32>,
    %236 = vector.extract_strided_slice %215 {offsets = [0, 8], sizes = [16, 8], strides = [1, 1]} : vector<16x96xbf16> to vector<16x8xbf16>
    %237 = vector.extract_strided_slice %215 {offsets = [0, 40], sizes = [16, 8], strides = [1, 1]} : vector<16x96xbf16> to vector<16x8xbf16>
    %238 = vector.extract_strided_slice %215 {offsets = [0, 72], sizes = [16, 8], strides = [1, 1]} : vector<16x96xbf16> to vector<16x8xbf16>
    %cst_105 = arith.constant dense<0.000000e+00> : vector<16x16xf32>
    %239 = tpu.matmul %236, %237, %cst_105 {dimension_numbers = #tpu.dot_dimension_numbers<[1], [1], [0], [0], [0, 0, 1, 0], [], []>} : vector<16x8xbf16>, vector<16x8xbf16>, vector<16x16xf32> -> vector<16x16xf32>
    %cst_106 = arith.constant 0.353553385 : f32
    %240 = vector.broadcast %cst_106 : f32 to vector<16x16xf32>
    %241 = arith.mulf %239, %240 : vector<16x16xf32>
    %242 = arith.addf %241, %25 : vector<16x16xf32>
    %cst_107 = arith.constant dense<0xFF800000> : vector<16xf32>
    %243 = vector.multi_reduction <maximumf>, %242, %cst_107 [1] : vector<16x16xf32> to vector<16xf32>
    %244 = vector.shape_cast %243 : vector<16xf32> to vector<16x1xf32>
    %245 = vector.broadcast %244 : vector<16x1xf32> to vector<16x16xf32>
    %246 = arith.subf %242, %245 : vector<16x16xf32>
    %247 = math.exp %246 : vector<16x16xf32>
    %cst_108 = arith.constant dense<0.000000e+00> : vector<16xf32>
    %248 = vector.multi_reduction <add>, %247, %cst_108 [1] : vector<16x16xf32> to vector<16xf32>
    %249 = vector.shape_cast %248 : vector<16xf32> to vector<16x1xf32>
    %250 = tpu.reciprocal %249 {approx = true} : vector<16x1xf32> -> vector<16x1xf32>
    %251 = vector.broadcast %250 : vector<16x1xf32> to vector<16x16xf32>
    %252 = arith.mulf %247, %251 : vector<16x16xf32>
    %253 = arith.truncf %252 : vector<16x16xf32> to vector<16x16xbf16>
    %cst_109 = arith.constant dense<0.000000e+00> : vector<16x8xf32>
    %254 = tpu.matmul %253, %238, %cst_109 {dimension_numbers = #tpu.dot_dimension_numbers<[1], [0], [0], [1], [0, 0, 1, 1], [], []>} : vector<16x16xbf16>, vector<16x8xbf16>, vector<16x8xf32> -> vector<16x8xf32>
    %c0_110 = arith.constant 0 : index
    %c8_111 = arith.constant 8 : index
    %255 = vector.load %arg18[%c0_110, %c8_111] : memref<16x32xf32, #tpu.memory_space<vmem>>, vector<16x8xf32>
    tpu.vector_store %arg18[%c0_110, %c8_111], %254 {strides = array<i32>} : memref<16x32xf32, #tpu.memory_space<vmem>>, vector<16x8xf32>,
    %256 = vector.extract_strided_slice %215 {offsets = [0, 16], sizes = [16, 8], strides = [1, 1]} : vector<16x96xbf16> to vector<16x8xbf16>
    %257 = vector.extract_strided_slice %215 {offsets = [0, 48], sizes = [16, 8], strides = [1, 1]} : vector<16x96xbf16> to vector<16x8xbf16>
    %258 = vector.extract_strided_slice %215 {offsets = [0, 80], sizes = [16, 8], strides = [1, 1]} : vector<16x96xbf16> to vector<16x8xbf16>
    %cst_112 = arith.constant dense<0.000000e+00> : vector<16x16xf32>
    %259 = tpu.matmul %256, %257, %cst_112 {dimension_numbers = #tpu.dot_dimension_numbers<[1], [1], [0], [0], [0, 0, 1, 0], [], []>} : vector<16x8xbf16>, vector<16x8xbf16>, vector<16x16xf32> -> vector<16x16xf32>
    %cst_113 = arith.constant 0.353553385 : f32
    %260 = vector.broadcast %cst_113 : f32 to vector<16x16xf32>
    %261 = arith.mulf %259, %260 : vector<16x16xf32>
    %262 = arith.addf %261, %25 : vector<16x16xf32>
    %cst_114 = arith.constant dense<0xFF800000> : vector<16xf32>
    %263 = vector.multi_reduction <maximumf>, %262, %cst_114 [1] : vector<16x16xf32> to vector<16xf32>
    %264 = vector.shape_cast %263 : vector<16xf32> to vector<16x1xf32>
    %265 = vector.broadcast %264 : vector<16x1xf32> to vector<16x16xf32>
    %266 = arith.subf %262, %265 : vector<16x16xf32>
    %267 = math.exp %266 : vector<16x16xf32>
    %cst_115 = arith.constant dense<0.000000e+00> : vector<16xf32>
    %268 = vector.multi_reduction <add>, %267, %cst_115 [1] : vector<16x16xf32> to vector<16xf32>
    %269 = vector.shape_cast %268 : vector<16xf32> to vector<16x1xf32>
    %270 = tpu.reciprocal %269 {approx = true} : vector<16x1xf32> -> vector<16x1xf32>
    %271 = vector.broadcast %270 : vector<16x1xf32> to vector<16x16xf32>
    %272 = arith.mulf %267, %271 : vector<16x16xf32>
    %273 = arith.truncf %272 : vector<16x16xf32> to vector<16x16xbf16>
    %cst_116 = arith.constant dense<0.000000e+00> : vector<16x8xf32>
    %274 = tpu.matmul %273, %258, %cst_116 {dimension_numbers = #tpu.dot_dimension_numbers<[1], [0], [0], [1], [0, 0, 1, 1], [], []>} : vector<16x16xbf16>, vector<16x8xbf16>, vector<16x8xf32> -> vector<16x8xf32>
    %c0_117 = arith.constant 0 : index
    %c16_118 = arith.constant 16 : index
    %275 = vector.load %arg18[%c0_117, %c16_118] : memref<16x32xf32, #tpu.memory_space<vmem>>, vector<16x8xf32>
    tpu.vector_store %arg18[%c0_117, %c16_118], %274 {strides = array<i32>} : memref<16x32xf32, #tpu.memory_space<vmem>>, vector<16x8xf32>,
    %276 = vector.extract_strided_slice %215 {offsets = [0, 24], sizes = [16, 8], strides = [1, 1]} : vector<16x96xbf16> to vector<16x8xbf16>
    %277 = vector.extract_strided_slice %215 {offsets = [0, 56], sizes = [16, 8], strides = [1, 1]} : vector<16x96xbf16> to vector<16x8xbf16>
    %278 = vector.extract_strided_slice %215 {offsets = [0, 88], sizes = [16, 8], strides = [1, 1]} : vector<16x96xbf16> to vector<16x8xbf16>
    %cst_119 = arith.constant dense<0.000000e+00> : vector<16x16xf32>
    %279 = tpu.matmul %276, %277, %cst_119 {dimension_numbers = #tpu.dot_dimension_numbers<[1], [1], [0], [0], [0, 0, 1, 0], [], []>} : vector<16x8xbf16>, vector<16x8xbf16>, vector<16x16xf32> -> vector<16x16xf32>
    %cst_120 = arith.constant 0.353553385 : f32
    %280 = vector.broadcast %cst_120 : f32 to vector<16x16xf32>
    %281 = arith.mulf %279, %280 : vector<16x16xf32>
    %282 = arith.addf %281, %25 : vector<16x16xf32>
    %cst_121 = arith.constant dense<0xFF800000> : vector<16xf32>
    %283 = vector.multi_reduction <maximumf>, %282, %cst_121 [1] : vector<16x16xf32> to vector<16xf32>
    %284 = vector.shape_cast %283 : vector<16xf32> to vector<16x1xf32>
    %285 = vector.broadcast %284 : vector<16x1xf32> to vector<16x16xf32>
    %286 = arith.subf %282, %285 : vector<16x16xf32>
    %287 = math.exp %286 : vector<16x16xf32>
    %cst_122 = arith.constant dense<0.000000e+00> : vector<16xf32>
    %288 = vector.multi_reduction <add>, %287, %cst_122 [1] : vector<16x16xf32> to vector<16xf32>
    %289 = vector.shape_cast %288 : vector<16xf32> to vector<16x1xf32>
    %290 = tpu.reciprocal %289 {approx = true} : vector<16x1xf32> -> vector<16x1xf32>
    %291 = vector.broadcast %290 : vector<16x1xf32> to vector<16x16xf32>
    %292 = arith.mulf %287, %291 : vector<16x16xf32>
    %293 = arith.truncf %292 : vector<16x16xf32> to vector<16x16xbf16>
    %cst_123 = arith.constant dense<0.000000e+00> : vector<16x8xf32>
    %294 = tpu.matmul %293, %278, %cst_123 {dimension_numbers = #tpu.dot_dimension_numbers<[1], [0], [0], [1], [0, 0, 1, 1], [], []>} : vector<16x16xbf16>, vector<16x8xbf16>, vector<16x8xf32> -> vector<16x8xf32>
    %c0_124 = arith.constant 0 : index
    %c24_125 = arith.constant 24 : index
    %295 = vector.load %arg18[%c0_124, %c24_125] : memref<16x32xf32, #tpu.memory_space<vmem>>, vector<16x8xf32>
    tpu.vector_store %arg18[%c0_124, %c24_125], %294 {strides = array<i32>} : memref<16x32xf32, #tpu.memory_space<vmem>>, vector<16x8xf32>,
    %c0_126 = arith.constant 0 : index
    %c0_127 = arith.constant 0 : index
    %296 = vector.load %arg18[%c0_126, %c0_127] : memref<16x32xf32, #tpu.memory_space<vmem>>, vector<16x32xf32>
    %297 = arith.truncf %296 : vector<16x32xf32> to vector<16x32xbf16>
    %c1_128 = arith.constant 1 : index
    %c0_129 = arith.constant 0 : index
    %c0_130 = arith.constant 0 : index
    %298 = vector.load %arg7[%c1_128, %c0_129, %c0_130] : memref<2x32x32xbf16, #tpu.memory_space<vmem>>, vector<1x32x32xbf16>
    %299 = vector.shape_cast %298 : vector<1x32x32xbf16> to vector<32x32xbf16>
    %cst_131 = arith.constant dense<0.000000e+00> : vector<16x32xf32>
    %300 = tpu.matmul %297, %299, %cst_131 {dimension_numbers = #tpu.dot_dimension_numbers<[1], [0], [0], [1], [0, 0, 1, 1], [], []>} : vector<16x32xbf16>, vector<32x32xbf16>, vector<16x32xf32> -> vector<16x32xf32>
    %c1_132 = arith.constant 1 : index
    %c0_133 = arith.constant 0 : index
    %c0_134 = arith.constant 0 : index
    %301 = vector.load %arg8[%c1_132, %c0_133, %c0_134] : memref<2x1x32xf32, #tpu.memory_space<vmem>>, vector<1x1x32xf32>
    %302 = vector.shape_cast %301 : vector<1x1x32xf32> to vector<1x32xf32>
    %303 = vector.broadcast %302 : vector<1x32xf32> to vector<16x32xf32>
    %304 = arith.addf %300, %303 : vector<16x32xf32>
    %305 = arith.addf %206, %304 : vector<16x32xf32>
    %c1_135 = arith.constant 1 : index
    %c0_136 = arith.constant 0 : index
    %c0_137 = arith.constant 0 : index
    %306 = vector.load %arg9[%c1_135, %c0_136, %c0_137] : memref<2x1x32xf32, #tpu.memory_space<vmem>>, vector<1x1x32xf32>
    %307 = vector.shape_cast %306 : vector<1x1x32xf32> to vector<1x32xf32>
    %c1_138 = arith.constant 1 : index
    %c0_139 = arith.constant 0 : index
    %c0_140 = arith.constant 0 : index
    %308 = vector.load %arg10[%c1_138, %c0_139, %c0_140] : memref<2x1x32xf32, #tpu.memory_space<vmem>>, vector<1x1x32xf32>
    %309 = vector.shape_cast %308 : vector<1x1x32xf32> to vector<1x32xf32>
    %cst_141 = arith.constant dense<0.000000e+00> : vector<16xf32>
    %310 = vector.multi_reduction <add>, %305, %cst_141 [1] : vector<16x32xf32> to vector<16xf32>
    %311 = vector.shape_cast %310 : vector<16xf32> to vector<16x1xf32>
    %cst_142 = arith.constant 3.200000e+01 : f32
    %312 = vector.broadcast %cst_142 : f32 to vector<16x1xf32>
    %313 = arith.divf %311, %312 : vector<16x1xf32>
    %314 = vector.broadcast %313 : vector<16x1xf32> to vector<16x32xf32>
    %315 = arith.subf %305, %314 : vector<16x32xf32>
    %316 = arith.mulf %315, %315 : vector<16x32xf32>
    %cst_143 = arith.constant dense<0.000000e+00> : vector<16xf32>
    %317 = vector.multi_reduction <add>, %316, %cst_143 [1] : vector<16x32xf32> to vector<16xf32>
    %318 = vector.shape_cast %317 : vector<16xf32> to vector<16x1xf32>
    %cst_144 = arith.constant 3.200000e+01 : f32
    %319 = vector.broadcast %cst_144 : f32 to vector<16x1xf32>
    %320 = arith.divf %318, %319 : vector<16x1xf32>
    %321 = vector.broadcast %313 : vector<16x1xf32> to vector<16x32xf32>
    %322 = arith.subf %305, %321 : vector<16x32xf32>
    %cst_145 = arith.constant 9.99999996E-13 : f32
    %323 = vector.broadcast %cst_145 : f32 to vector<16x1xf32>
    %324 = arith.addf %320, %323 : vector<16x1xf32>
    %325 = math.rsqrt %324 : vector<16x1xf32>
    %326 = vector.broadcast %325 : vector<16x1xf32> to vector<16x32xf32>
    %327 = arith.mulf %322, %326 : vector<16x32xf32>
    %328 = vector.broadcast %307 : vector<1x32xf32> to vector<16x32xf32>
    %329 = arith.mulf %327, %328 : vector<16x32xf32>
    %330 = vector.broadcast %309 : vector<1x32xf32> to vector<16x32xf32>
    %331 = arith.addf %329, %330 : vector<16x32xf32>
    %332 = arith.truncf %331 : vector<16x32xf32> to vector<16x32xbf16>
    %c1_146 = arith.constant 1 : index
    %c0_147 = arith.constant 0 : index
    %c0_148 = arith.constant 0 : index
    %333 = vector.load %arg11[%c1_146, %c0_147, %c0_148] : memref<2x32x64xbf16, #tpu.memory_space<vmem>>, vector<1x32x64xbf16>
    %334 = vector.shape_cast %333 : vector<1x32x64xbf16> to vector<32x64xbf16>
    %cst_149 = arith.constant dense<0.000000e+00> : vector<16x64xf32>
    %335 = tpu.matmul %332, %334, %cst_149 {dimension_numbers = #tpu.dot_dimension_numbers<[1], [0], [0], [1], [0, 0, 1, 1], [], []>} : vector<16x32xbf16>, vector<32x64xbf16>, vector<16x64xf32> -> vector<16x64xf32>
    %c1_150 = arith.constant 1 : index
    %c0_151 = arith.constant 0 : index
    %c0_152 = arith.constant 0 : index
    %336 = vector.load %arg12[%c1_150, %c0_151, %c0_152] : memref<2x1x64xf32, #tpu.memory_space<vmem>>, vector<1x1x64xf32>
    %337 = vector.shape_cast %336 : vector<1x1x64xf32> to vector<1x64xf32>
    %338 = vector.broadcast %337 : vector<1x64xf32> to vector<16x64xf32>
    %339 = arith.addf %335, %338 : vector<16x64xf32>
    %cst_153 = arith.constant 5.000000e-01 : f32
    %340 = vector.broadcast %cst_153 : f32 to vector<16x64xf32>
    %341 = arith.mulf %340, %339 : vector<16x64xf32>
    %cst_154 = arith.constant 4.471500e-02 : f32
    %342 = vector.broadcast %cst_154 : f32 to vector<16x64xf32>
    %343 = arith.mulf %342, %339 : vector<16x64xf32>
    %344 = arith.mulf %343, %339 : vector<16x64xf32>
    %345 = arith.mulf %344, %339 : vector<16x64xf32>
    %346 = arith.addf %339, %345 : vector<16x64xf32>
    %cst_155 = arith.constant 0.797884583 : f32
    %347 = vector.broadcast %cst_155 : f32 to vector<16x64xf32>
    %348 = arith.mulf %347, %346 : vector<16x64xf32>
    %349 = math.tanh %348 : vector<16x64xf32>
    %cst_156 = arith.constant 1.000000e+00 : f32
    %350 = vector.broadcast %cst_156 : f32 to vector<16x64xf32>
    %351 = arith.addf %350, %349 : vector<16x64xf32>
    %352 = arith.mulf %341, %351 : vector<16x64xf32>
    %353 = arith.truncf %352 : vector<16x64xf32> to vector<16x64xbf16>
    %c1_157 = arith.constant 1 : index
    %c0_158 = arith.constant 0 : index
    %c0_159 = arith.constant 0 : index
    %354 = vector.load %arg13[%c1_157, %c0_158, %c0_159] : memref<2x64x32xbf16, #tpu.memory_space<vmem>>, vector<1x64x32xbf16>
    %355 = vector.shape_cast %354 : vector<1x64x32xbf16> to vector<64x32xbf16>
    %cst_160 = arith.constant dense<0.000000e+00> : vector<16x32xf32>
    %356 = tpu.matmul %353, %355, %cst_160 {dimension_numbers = #tpu.dot_dimension_numbers<[1], [0], [0], [1], [0, 0, 1, 1], [], []>} : vector<16x64xbf16>, vector<64x32xbf16>, vector<16x32xf32> -> vector<16x32xf32>
    %c1_161 = arith.constant 1 : index
    %c0_162 = arith.constant 0 : index
    %c0_163 = arith.constant 0 : index
    %357 = vector.load %arg14[%c1_161, %c0_162, %c0_163] : memref<2x1x32xf32, #tpu.memory_space<vmem>>, vector<1x1x32xf32>
    %358 = vector.shape_cast %357 : vector<1x1x32xf32> to vector<1x32xf32>
    %359 = vector.broadcast %358 : vector<1x32xf32> to vector<16x32xf32>
    %360 = arith.addf %356, %359 : vector<16x32xf32>
    %361 = arith.addf %331, %360 : vector<16x32xf32>
    %c1_164 = arith.constant 1 : index
    %c0_165 = arith.constant 0 : index
    %c0_166 = arith.constant 0 : index
    %362 = vector.load %arg15[%c1_164, %c0_165, %c0_166] : memref<2x1x32xf32, #tpu.memory_space<vmem>>, vector<1x1x32xf32>
    %363 = vector.shape_cast %362 : vector<1x1x32xf32> to vector<1x32xf32>
    %c1_167 = arith.constant 1 : index
    %c0_168 = arith.constant 0 : index
    %c0_169 = arith.constant 0 : index
    %364 = vector.load %arg16[%c1_167, %c0_168, %c0_169] : memref<2x1x32xf32, #tpu.memory_space<vmem>>, vector<1x1x32xf32>
    %365 = vector.shape_cast %364 : vector<1x1x32xf32> to vector<1x32xf32>
    %cst_170 = arith.constant dense<0.000000e+00> : vector<16xf32>
    %366 = vector.multi_reduction <add>, %361, %cst_170 [1] : vector<16x32xf32> to vector<16xf32>
    %367 = vector.shape_cast %366 : vector<16xf32> to vector<16x1xf32>
    %cst_171 = arith.constant 3.200000e+01 : f32
    %368 = vector.broadcast %cst_171 : f32 to vector<16x1xf32>
    %369 = arith.divf %367, %368 : vector<16x1xf32>
    %370 = vector.broadcast %369 : vector<16x1xf32> to vector<16x32xf32>
    %371 = arith.subf %361, %370 : vector<16x32xf32>
    %372 = arith.mulf %371, %371 : vector<16x32xf32>
    %cst_172 = arith.constant dense<0.000000e+00> : vector<16xf32>
    %373 = vector.multi_reduction <add>, %372, %cst_172 [1] : vector<16x32xf32> to vector<16xf32>
    %374 = vector.shape_cast %373 : vector<16xf32> to vector<16x1xf32>
    %cst_173 = arith.constant 3.200000e+01 : f32
    %375 = vector.broadcast %cst_173 : f32 to vector<16x1xf32>
    %376 = arith.divf %374, %375 : vector<16x1xf32>
    %377 = vector.broadcast %369 : vector<16x1xf32> to vector<16x32xf32>
    %378 = arith.subf %361, %377 : vector<16x32xf32>
    %cst_174 = arith.constant 9.99999996E-13 : f32
    %379 = vector.broadcast %cst_174 : f32 to vector<16x1xf32>
    %380 = arith.addf %376, %379 : vector<16x1xf32>
    %381 = math.rsqrt %380 : vector<16x1xf32>
    %382 = vector.broadcast %381 : vector<16x1xf32> to vector<16x32xf32>
    %383 = arith.mulf %378, %382 : vector<16x32xf32>
    %384 = vector.broadcast %363 : vector<1x32xf32> to vector<16x32xf32>
    %385 = arith.mulf %383, %384 : vector<16x32xf32>
    %386 = vector.broadcast %365 : vector<1x32xf32> to vector<16x32xf32>
    %387 = arith.addf %385, %386 : vector<16x32xf32>
    %c0_175 = arith.constant 0 : index
    %c0_176 = arith.constant 0 : index
    %388 = vector.load %arg2[%c0_175, %c0_176] : memref<2x16xf32, #tpu.memory_space<vmem>>, vector<2x16xf32>
    %cst_177 = arith.constant dense<0.000000e+00> : vector<2x32xf32>
    %389 = tpu.matmul %388, %387, %cst_177 {dimension_numbers = #tpu.dot_dimension_numbers<[1], [0], [0], [1], [0, 0, 1, 1], [], []>} : vector<2x16xf32>, vector<16x32xf32>, vector<2x32xf32> -> vector<2x32xf32>
    %c0_178 = arith.constant 0 : index
    %c0_179 = arith.constant 0 : index
    %390 = vector.load %arg17[%c0_178, %c0_179] : memref<2x32xf32, #tpu.memory_space<vmem>>, vector<2x32xf32>
    tpu.vector_store %arg17[%c0_178, %c0_179], %389 {strides = array<i32>} : memref<2x32xf32, #tpu.memory_space<vmem>>, vector<2x32xf32>,
    return
  }
}

</mosaic_0001>

<bundles_post_ra>
// kernel: tpu_custom_call.1
= control target key start
LH: loop header
LB: loop body
LE: loop exit
PB: predicated region body
PF: predicated region fallthrough
CT: control target
= control target key end

     0   :  { %s3253_s0 = inlined_call_operand.hbm [shape: f32[16,32], index: 0, kind: input, shape index: {}]   ;;  %s3254_s1 = inlined_call_operand.hbm [shape: f32[16,16], index: 1, kind: input, shape index: {}]   ;;  %s3255_s2 = inlined_call_operand.vmem [shape: f32[2,16], index: 2, kind: input, shape index: {}]   ;;  %s3256_s3 = inlined_call_operand.vmem [shape: f32[1,32], index: 3, kind: input, shape index: {}]   ;;  %s3257_s4 = inlined_call_operand.hbm [shape: f32[1,32], index: 4, kind: input, shape index: {}]   ;;  %s3258_s5 = inlined_call_operand.vmem [shape: bf16[2,32,96], index: 5, kind: input, shape index: {}]   ;;  %s3259_s6 = inlined_call_operand.vmem [shape: f32[2,1,96], index: 6, kind: input, shape index: {}]   ;;  %s3260_s7 = inlined_call_operand.vmem [shape: bf16[2,32,32], index: 7, kind: input, shape index: {}]   ;;  %s3261_s8 = inlined_call_operand.vmem [shape: f32[2,1,32], index: 8, kind: input, shape index: {}]   ;;  %s3262_s9 = inlined_call_operand.vmem [shape: f32[2,1,32], index: 9, kind: input, shape index: {}]   ;;  %s3263_s10 = inlined_call_operand.vmem [shape: f32[2,1,32], index: 10, kind: input, shape index: {}]   ;;  %s3264_s11 = inlined_call_operand.vmem [shape: bf16[2,32,64], index: 11, kind: input, shape index: {}]   ;;  %s3265_s12 = inlined_call_operand.vmem [shape: f32[2,1,64], index: 12, kind: input, shape index: {}]   ;;  %s3266_s13 = inlined_call_operand.vmem [shape: bf16[2,64,32], index: 13, kind: input, shape index: {}]   ;;  %s3267_s14 = inlined_call_operand.vmem [shape: f32[2,1,32], index: 14, kind: input, shape index: {}]   ;;  %s3268_s15 = inlined_call_operand.vmem [shape: f32[2,1,32], index: 15, kind: input, shape index: {}]   ;;  %s3269_s16 = inlined_call_operand.vmem [shape: f32[2,1,32], index: 16, kind: input, shape index: {}]   ;;  %s3270_s17 = inlined_call_operand.hbm [shape: f32[2,32], index: 17, kind: output, shape index: {}]  }
   0x1   :  { %3281 = sst [smem:[#allocation13_spill]] %s3253_s0 }
   0x2   :  { %3282 = sst [smem:[#allocation14_spill]] %s3254_s1 }
   0x3   :  { %3283 = sst [smem:[#allocation15_spill]] %s3270_s17 }
   0x4   :  { %22 = vsyncpa [#allocation4], 0 }
   0x5   :  { %23 = vsyncpa [#allocation7], 0 }
   0x6   :  { %24 = vsyncpa [#allocation5], 0  ;;  %s2681_s24 = smov [#allocation6]   ;;  %s2682_s26 = smov [#allocation3]  }
   0x7   :  { %s42_s25 = sshll.u32 %s2681_s24, 4  ;;  %s30_s27 = sshll.u32 %s2682_s26, 4  ;;  %s43_s25 = int_to_ptr.vmem [resolvable:$true] %s42_s25  ;;  %s2793_s27 = int_to_ptr.vmem [resolvable:$true] %s30_s27 }
   0x8   :  { %s3284_s0 = sld [smem:[#allocation14_spill]] }
   0xe   :  { %s2587_s30 = scalar_lea.hbm %s3284_s0, 256 }
   0xf   :  { %p2588_p0 = scmp.ne.s32.totalorder %s3284_s0, %s2587_s30  ;;  %p2591_p1 = scmp.lt.u32.totalorder %s2587_s30, %s3284_s0 }
  0x11   :  { %p2593_p2 = pnand %p2591_p1, %p2588_p0 }
  0x13   :  { %2596 = shalt.err (!%p2593_p2)
}
  0x14   :  { %s2597_s21 = scalar_lea.vmem %s43_s25, 256  ;;  %p2602_p4 = scmp.lt.s32.totalorder %s43_s25, %s43_s25 }
  0x15   :  { %p2598_p3 = scmp.ne.s32.totalorder %s43_s25, %s2597_s21  ;;  %p2603_p5 = scmp.lt.s32.totalorder %s2597_s21, %s2597_s21 }
  0x17   :  { %p2604_p6 = por %p2603_p5, %p2602_p4 }
  0x19   :  { %p2605_p7 = pnand %p2604_p6, %p2598_p3 }
  0x1b   :  { %2608 = shalt.err (!%p2605_p7)
}
  0x1c   :  { %s2683_s22 = smov 128   ;;  %s3278_s23 = smov 8  }
  0x1d   :  { %48 = dma.hbm_to_vmem [thread:$0]  %s3284_s0, 256, %s43_s25, [#allocation7], %s2683_s22, %s2683_s22, %s3278_s23  }
  0x1e   :  { %s3285_s18 = sld [smem:[#allocation13_spill]] }
  0x24   :  { %s2609_s30 = scalar_lea.hbm %s3285_s18, 256 }
  0x25   :  { %p2610_p8 = scmp.ne.s32.totalorder %s3285_s18, %s2609_s30  ;;  %p2613_p9 = scmp.lt.u32.totalorder %s2609_s30, %s3285_s18 }
  0x27   :  { %p2615_p10 = pnand %p2613_p9, %p2610_p8 }
  0x29   :  { %2618 = shalt.err (!%p2615_p10)
}
  0x2a   :  { %s2619_s17 = scalar_lea.vmem %s2793_s27, 256  ;;  %p2624_p12 = scmp.lt.s32.totalorder %s2793_s27, %s2793_s27 }
  0x2b   :  { %p2620_p11 = scmp.ne.s32.totalorder %s2793_s27, %s2619_s17  ;;  %p2625_p13 = scmp.lt.s32.totalorder %s2619_s17, %s2619_s17 }
  0x2d   :  { %p2626_p0 = por %p2625_p13, %p2624_p12 }
  0x2f   :  { %p2627_p1 = pnand %p2626_p0, %p2620_p11 }
  0x31   :  { %2630 = shalt.err (!%p2627_p1)
}
  0x32   :  { %36 = dma.hbm_to_vmem [thread:$0]  %s3285_s18, 256, %s2793_s27, [#allocation4], %s2683_s22, %s2683_s22, %s3278_s23  }
  0x33   :  { %s2685_s24 = smov [#allocation8]   ;;  %s2631_s30 = scalar_lea.hbm %s3257_s4, 16 }
  0x34   :  { %s59_s26 = sshll.u32 %s2685_s24, 4  ;;  %p2632_p2 = scmp.ne.s32.totalorder %s3257_s4, %s2631_s30  ;;  %s60_s26 = int_to_ptr.vmem [resolvable:$true] %s59_s26 }
  0x35   :  { %p2635_p3 = scmp.lt.u32.totalorder %s2631_s30, %s3257_s4 }
  0x37   :  { %p2637_p4 = pnand %p2635_p3, %p2632_p2 }
  0x39   :  { %2640 = shalt.err (!%p2637_p4)
}
  0x3a   :  { %s2641_s21 = scalar_lea.vmem %s60_s26, 16  ;;  %s2645_s27 = scalar_lea.vmem %s60_s26, 32 }
  0x3b   :  { %p2642_p5 = scmp.ne.s32.totalorder %s60_s26, %s2641_s21  ;;  %p2646_p6 = scmp.lt.s32.totalorder %s60_s26, %s60_s26 }
  0x3c   :  { %p2647_p7 = scmp.lt.s32.totalorder %s2645_s27, %s2641_s21 }
  0x3e   :  { %p2648_p8 = por %p2647_p7, %p2646_p6 }
  0x40   :  { %p2649_p9 = pnand %p2648_p8, %p2642_p5 }
  0x42   :  { %2652 = shalt.err (!%p2649_p9)
}
  0x43   :  { %62 = dma.hbm_to_vmem [thread:$0]  %s3257_s4, 16, %s60_s26, [#allocation7]  }
  0x44   :  { %2675 = dma.done.wait [#allocation4], 256  }
  0x45   :  { %2676 = vsyncadd [#allocation4], 4294967040 }
  0x46   :  { %2677 = dma.done.wait [#allocation7], 272  }
  0x47   :  { %2678 = vsyncadd [#allocation7], 4294967024  ;;  %vm101_vm0 = vcmask 261120   ;;  %v97_v0 = vld [vmem:[#allocation3] sm:$0xff]  ;;  %v98_v1 = vld [vmem:[#allocation3 + $0x8] sm:$0xff]  ;;  %v2686_v15 = vmov 0.0  }
  0x48   :  { %v102_v2 = vsel %vm101_vm0, %v97_v0, 0.0  ;;  %v105_v3 = vsel %vm101_vm0, %v98_v1, 0.0  ;;  %v2475_v14 = vld [vmem:[%s3258_s5] sm:$0xff]   ;;  %2275 = vmatprep.subr.bf16.mxu1 %v2686_v15  ;;  %2289 = vmatprep.subr.bf16.mxu0 %v2686_v15  ;;  %v2476_v16 = vld [vmem:[%s3258_s5 + $0x8] sm:$0xff]   ;;  %vm2687_vm1 = vmmov 0   ;;  %s2689_s19 = smov 96  }
  0x49   :  { %103 = vadd.xlane.f32.xlu0 %v102_v2  ;;  %2276 = vmatpush3.bf16.msra.mxu1 %v2475_v14  ;;  %v2121_v25 = vld [vmem:[%s3256_s3] ss:$0 sm:$0xff]  ;;  %v2122_v29 = vld [vmem:[#allocation8] ss:$0 sm:$0xff]  ;;  %s2688_s3 = smov 88   ;;  %s2690_s1 = smov 120  }
  0x4a   :  { %2279 = vmatprep.mubr.msk.bf16.mxu1 %vm2687_vm1, %v2686_v15  ;;  %2277 = vmatprep.subr.bf16.mxu1 %v2686_v15  ;;  %v2123_v34 = vld [vmem:[%s3259_s6] ss:$0 sm:$0xff]  ;;  %s2691_s17 = smov 112   ;;  %s2692_s20 = smov 80   ;;  %vm219_vm2 = vcmask 64512   ;;  %vm271_vm3 = vcmask 130048  }
  0x4b   :  { %2291 = vmatprep.mubr.msk.bf16.mxu0 %vm2687_vm1, %v2686_v15  ;;  %s2693_s21 = smov 104   ;;  %s2694_s27 = smov 72   ;;  %v2908_v54 = vld [vmem:[#allocation6] sm:$0xff]  ;;  %v2910_v58 = vld [vmem:[#allocation6 + $0x8] sm:$0xff]  ;;  %vm477_vm4 = vcmask 130112   ;;  %vm613_vm5 = vcmask 195712  }
  0x4c   :  { %s2695_s22 = smov 64   ;;  %s2696_s18 = smov 48   ;;  %vm749_vm6 = vcmask 261312   ;;  %vm994_vm7 = vcmask 523264   ;;  %vm2103_vm8 = vcmask 254976  }
  0x4d   :  { %106 = vadd.xlane.f32.xlu0 %v105_v3  ;;  %2278 = vmatpush3.bf16.msra.mxu1 %v2476_v16  ;;  %s3280_s4 = smov 40   ;;  %s2698_s25 = smov 56  }
  0x4e   :  { %2283 = vmatprep.subr.bf16.mxu1 %v2686_v15  ;;  %s3276_s29 = smov 16   ;;  %s3274_s30 = smov 24  }
  0xd6   :  { %v104_v4 = vpop.xlane.xlu0 %103 }
  0xd7   :  { %v109_v5 = vmul.f32 0.03125, %v104_v4 }
  0xd9   :  { %v111_v6 = vsub.f32 %v97_v0, %v109_v5 }
  0xda   :  { %v107_v7 = vpop.xlane.xlu0 %106 }
  0xdb   :  { %v110_v8 = vmul.f32 0.03125, %v107_v7  ;;  %v113_v9 = vmul.f32 %v111_v6, %v111_v6 }
  0xdd   :  { %v112_v10 = vsub.f32 %v98_v1, %v110_v8  ;;  %v115_v11 = vsel %vm101_vm0, %v113_v9, 0.0 }
  0xde   :  { %116 = vadd.xlane.f32.xlu1 %v115_v11 }
  0xdf   :  { %v114_v12 = vmul.f32 %v112_v10, %v112_v10 }
  0xe1   :  { %v118_v13 = vsel %vm101_vm0, %v114_v12, 0.0 }
  0xe2   :  { %119 = vadd.xlane.f32.xlu1 %v118_v13 }
 0x16b   :  { %v117_v17 = vpop.xlane.xlu1 %116 }
 0x16c   :  { %v121_v18 = vmul.f32 0.03125, %v117_v17 }
 0x16e   :  { %v123_v19 = vadd.f32 1e-12, %v121_v18 }
 0x16f   :  { %v120_v20 = vpop.xlane.xlu1 %119 }
 0x170   :  { %2495 = vrsqrt.f32 %v123_v19  ;;  %v122_v21 = vmul.f32 0.03125, %v120_v20 }
 0x172   :  { %v124_v22 = vadd.f32 1e-12, %v122_v21 }
 0x174   :  { %2497 = vrsqrt.f32 %v124_v22 }
 0x17a   :  { %v2496_v23 = vpop.eup %2495 }
 0x17b   :  { %v127_v24 = vmul.f32 %v2496_v23, %v111_v6 }
 0x17d   :  { %v135_v28 = vmul.f32 %v2121_v25, %v127_v24 }
 0x17e   :  { %v2498_v26 = vpop.eup %2497 }
 0x17f   :  { %v128_v27 = vmul.f32 %v2498_v26, %v112_v10  ;;  %v2859_v31 = vadd.f32 %v2122_v29, %v135_v28 }
 0x181   :  { %v136_v30 = vmul.f32 %v2121_v25, %v128_v27 }
 0x183   :  { %v2861_v32 = vadd.f32 %v2122_v29, %v136_v30 }
 0x185   :  { %v147_v33 = vpack.c.bf16 %v2861_v32, %v2859_v31 }
 0x187   :  { %2280 = vmatmul.mubr.msk.bf16.vlgmr.msra.gmra.mrb[0].mxu1 %vm101_vm0, %v147_v33 }
 0x188   :  { %2285 = vmatprep.mubr.msk.bf16.mxu1 %vm2687_vm1, %v2686_v15 }
 0x25a   :  { %v208_v35 = vpop.f32.mrb[0].mxu1 }
 0x25b   :  { %v2281_v36 = vpop.f32.mrb[1].mxu1  ;;  %v209_v38 = vadd.f32 %v2123_v34, %v208_v35 }
 0x25c   :  { %v211_v37 = vpop.f32.mrb[2].mxu1 }
 0x25d   :  { %v212_v39 = vadd.f32 %v2123_v34, %v211_v37  ;;  %v2282_v40 = vpop.f32.mrb[3].mxu1 }
 0x25f   :  { %v2871_v41 = vpack.c.bf16 %v212_v39, %v209_v38 }
 0x261   :  { %346 = vrot.lane.b32.xlu1 %v2871_v41, %s2688_s3  ;;  %217 = vrot.lane.b32.xlu0 %v2871_v41, %s2689_s19 }
 0x265   :  { %344 = vrot.lane.b32.xlu1 %v2871_v41, %s2690_s1  ;;  %480 = vrot.lane.b32.xlu0 %v2871_v41, %s2691_s17 }
 0x269   :  { %482 = vrot.lane.b32.xlu1 %v2871_v41, %s2692_s20  ;;  %616 = vrot.lane.b32.xlu0 %v2871_v41, %s2693_s21 }
 0x26d   :  { %618 = vrot.lane.b32.xlu1 %v2871_v41, %s2694_s27 }
 0x2d3   :  { %v218_v42 = vpop.permute.xlu0 %217  ;;  %v347_v44 = vpop.permute.xlu1 %346 }
 0x2d4   :  { %v224_v43 = vsel %vm219_vm2, %v218_v42, 0  ;;  %v352_v46 = vsel %vm219_vm2, %v347_v44, 0 }
 0x2d5   :  { %2284 = vmatpush3.bf16.xpose.msra.mxu1 %v224_v43 }
 0x2d6   :  { %2295 = vmatprep.subr.bf16.mxu1 %v2686_v15 }
 0x2d7   :  { %v345_v45 = vpop.permute.xlu1 %344  ;;  %v481_v50 = vpop.permute.xlu0 %480 }
 0x2db   :  { %v483_v47 = vpop.permute.xlu1 %482  ;;  %v617_v52 = vpop.permute.xlu0 %616 }
 0x2dc   :  { %2286 = vmatmul.mubr.msk.bf16.vlgmr.msra.gmra.mrb[4].mxu1 %vm219_vm2, %v2871_v41  ;;  %v488_v48 = vsel %vm219_vm2, %v483_v47, 0 }
 0x2dd   :  { %2296 = vmatpush3.bf16.xpose.msra.mxu1 %v352_v46  ;;  %2297 = vmatprep.mubr.msk.bf16.mxu1 %vm2687_vm1, %v2686_v15 }
 0x2de   :  { %2307 = vmatprep.subr.bf16.mxu1 %v2686_v15 }
 0x2df   :  { %v619_v49 = vpop.permute.xlu1 %618 }
 0x2e0   :  { %v624_v51 = vsel %vm219_vm2, %v619_v49, 0 }
 0x2e4   :  { %2298 = vmatmul.mubr.msk.bf16.vlgmr.msra.gmra.mrb[8].mxu1 %vm219_vm2, %v345_v45 }
 0x2e5   :  { %2308 = vmatpush3.bf16.xpose.msra.mxu1 %v488_v48  ;;  %2309 = vmatprep.mubr.msk.bf16.mxu1 %vm2687_vm1, %v2686_v15 }
 0x2e6   :  { %2319 = vmatprep.subr.bf16.mxu1 %v2686_v15 }
 0x2ec   :  { %2310 = vmatmul.mubr.msk.bf16.vlgmr.msra.gmra.mrb[12].mxu1 %vm219_vm2, %v481_v50 }
 0x2ed   :  { %2320 = vmatpush3.bf16.xpose.msra.mxu1 %v624_v51  ;;  %2321 = vmatprep.mubr.msk.bf16.mxu1 %vm2687_vm1, %v2686_v15 }
 0x2ee   :  { %2331 = vmatprep.subr.bf16.mxu1 %v2686_v15 }
 0x2f4   :  { %2322 = vmatmul.mubr.msk.bf16.vlgmr.msra.gmra.mrb[16].mxu1 %vm219_vm2, %v617_v52 }
 0x2f5   :  { %2335 = vmatprep.mubr.msk.bf16.mxu1 %vm2687_vm1, %v2686_v15 }
 0x3af   :  { %v260_v53 = vpop.f32.mrb[4].mxu1 }
 0x3b0   :  { %v267_v55 = vmul.f32 0.35355338, %v260_v53  ;;  %v2287_v56 = vpop.f32.mrb[5].mxu1 }
 0x3b1   :  { %v263_v57 = vpop.f32.mrb[6].mxu1 }
 0x3b2   :  { %v268_v59 = vmul.f32 0.35355338, %v263_v57  ;;  %v2288_v60 = vpop.f32.mrb[7].mxu1  ;;  %v269_v61 = vadd.f32 %v267_v55, %v2908_v54 }
 0x3b4   :  { %v272_v62 = vsel %vm271_vm3, %v269_v61, -inf  ;;  %v270_v63 = vadd.f32 %v268_v59, %v2910_v58 }
 0x3b5   :  { %273 = vmax.xlane.f32.xlu1 %v272_v62 }
 0x3b6   :  { %v275_v0 = vsel %vm271_vm3, %v270_v63, -inf }
 0x3b7   :  { %276 = vmax.xlane.f32.xlu0 %v275_v0  ;;  %v388_v1 = vpop.f32.mrb[8].mxu1 }
 0x3b8   :  { %v395_v2 = vmul.f32 0.35355338, %v388_v1  ;;  %v2299_v3 = vpop.f32.mrb[9].mxu1 }
 0x3b9   :  { %v391_v4 = vpop.f32.mrb[10].mxu1 }
 0x3ba   :  { %v396_v5 = vmul.f32 0.35355338, %v391_v4  ;;  %v2300_v6 = vpop.f32.mrb[11].mxu1  ;;  %v397_v7 = vadd.f32 %v395_v2, %v2908_v54 }
 0x3bc   :  { %v399_v8 = vsel %vm271_vm3, %v397_v7, -inf  ;;  %v398_v9 = vadd.f32 %v396_v5, %v2910_v58 }
 0x3bd   :  { %400 = vmax.xlane.f32.xlu0 %v399_v8 }
 0x3be   :  { %v402_v13 = vsel %vm271_vm3, %v398_v9, -inf }
 0x3bf   :  { %v524_v10 = vpop.f32.mrb[12].mxu1 }
 0x3c0   :  { %v531_v11 = vmul.f32 0.35355338, %v524_v10  ;;  %v2311_v12 = vpop.f32.mrb[13].mxu1 }
 0x3c1   :  { %403 = vmax.xlane.f32.xlu0 %v402_v13  ;;  %v527_v14 = vpop.f32.mrb[14].mxu1 }
 0x3c2   :  { %v532_v16 = vmul.f32 0.35355338, %v527_v14  ;;  %v2312_v17 = vpop.f32.mrb[15].mxu1  ;;  %v533_v18 = vadd.f32 %v531_v11, %v2908_v54 }
 0x3c4   :  { %v535_v19 = vsel %vm271_vm3, %v533_v18, -inf  ;;  %v534_v20 = vadd.f32 %v532_v16, %v2910_v58 }
 0x3c5   :  { %536 = vmax.xlane.f32.xlu1 %v535_v19 }
 0x3c6   :  { %v538_v21 = vsel %vm271_vm3, %v534_v20, -inf }
 0x3c7   :  { %539 = vmax.xlane.f32.xlu0 %v538_v21  ;;  %v660_v22 = vpop.f32.mrb[16].mxu1 }
 0x3c8   :  { %v667_v23 = vmul.f32 0.35355338, %v660_v22  ;;  %v2323_v24 = vpop.f32.mrb[17].mxu1 }
 0x3c9   :  { %v663_v25 = vpop.f32.mrb[18].mxu1 }
 0x3ca   :  { %v668_v26 = vmul.f32 0.35355338, %v663_v25  ;;  %v2324_v27 = vpop.f32.mrb[19].mxu1  ;;  %v669_v28 = vadd.f32 %v667_v23, %v2908_v54 }
 0x3cc   :  { %v671_v29 = vsel %vm271_vm3, %v669_v28, -inf  ;;  %v670_v30 = vadd.f32 %v668_v26, %v2910_v58 }
 0x3cd   :  { %672 = vmax.xlane.f32.xlu1 %v671_v29 }
 0x3ce   :  { %v674_v33 = vsel %vm271_vm3, %v670_v30, -inf }
 0x3cf   :  { %675 = vmax.xlane.f32.xlu0 %v674_v33 }
 0x3de   :  { %295 = vrot.lane.b32.xlu1 %v2871_v41, %s2695_s22 }
 0x442   :  { %v274_v34 = vpop.xlane.xlu1 %273 }
 0x443   :  { %v278_v35 = vsub.f32 %v269_v61, %v274_v34 }
 0x444   :  { %v277_v36 = vpop.xlane.xlu0 %276 }
 0x445   :  { %v280_v37 = vmul.f32 1.442695, %v278_v35  ;;  %v279_v38 = vsub.f32 %v270_v63, %v277_v36 }
 0x447   :  { %2499 = vpow2.f32 %v280_v37  ;;  %v282_v39 = vmul.f32 1.442695, %v279_v38 }
 0x449   :  { %2501 = vpow2.f32 %v282_v39 }
 0x44a   :  { %v401_v40 = vpop.xlane.xlu0 %400 }
 0x44b   :  { %v405_v42 = vsub.f32 %v397_v7, %v401_v40 }
 0x44d   :  { %v407_v43 = vmul.f32 1.442695, %v405_v42 }
 0x44e   :  { %v404_v44 = vpop.xlane.xlu0 %403 }
 0x44f   :  { %2503 = vpow2.f32 %v407_v43  ;;  %v406_v45 = vsub.f32 %v398_v9, %v404_v44 }
 0x451   :  { %v2500_v46 = vpop.eup %2499  ;;  %v409_v47 = vmul.f32 1.442695, %v406_v45 }
 0x452   :  { %v537_v48 = vpop.xlane.xlu1 %536  ;;  %v284_v49 = vsel %vm271_vm3, %v2500_v46, 0.0 }
 0x453   :  { %v2502_v50 = vpop.eup %2501  ;;  %2505 = vpow2.f32 %v409_v47  ;;  %v541_v51 = vsub.f32 %v533_v18, %v537_v48  ;;  %285 = vadd.xlane.f32.xlu1 %v284_v49 }
 0x454   :  { %v540_v52 = vpop.xlane.xlu0 %539  ;;  %v287_v53 = vsel %vm271_vm3, %v2502_v50, 0.0 }
 0x455   :  { %v543_v55 = vmul.f32 1.442695, %v541_v51  ;;  %v542_v56 = vsub.f32 %v534_v20, %v540_v52  ;;  %288 = vadd.xlane.f32.xlu0 %v287_v53 }
 0x457   :  { %2507 = vpow2.f32 %v543_v55  ;;  %v545_v57 = vmul.f32 1.442695, %v542_v56 }
 0x459   :  { %v2504_v59 = vpop.eup %2503  ;;  %2509 = vpow2.f32 %v545_v57  ;;  %v2477_v57 = vld [vmem:[%s3260_s7] sm:$0xff]  }
 0x45a   :  { %v673_v60 = vpop.xlane.xlu1 %672  ;;  %v411_v61 = vsel %vm271_vm3, %v2504_v59, 0.0  ;;  %2332 = vmatpush3.bf16.msra.mxu1 %v2477_v57  ;;  %v2483_v57 = vld [vmem:[%s3266_s13 + $0x10] sm:$0xff]  }
 0x45b   :  { %v677_v62 = vsub.f32 %v669_v28, %v673_v60  ;;  %412 = vadd.xlane.f32.xlu1 %v411_v61  ;;  %v2478_v60 = vld [vmem:[%s3260_s7 + $0x8] sm:$0xff]   ;;  %2333 = vmatprep.subr.bf16.mxu1 %v2686_v15 }
 0x45c   :  { %v676_v63 = vpop.xlane.xlu0 %675 }
 0x45d   :  { %v2506_v0 = vpop.eup %2505  ;;  %v679_v1 = vmul.f32 1.442695, %v677_v62  ;;  %v678_v2 = vsub.f32 %v670_v30, %v676_v63 }
 0x45e   :  { %v296_v3 = vpop.permute.xlu1 %295  ;;  %v414_v4 = vsel %vm271_vm3, %v2506_v0, 0.0  ;;  %2334 = vmatpush3.bf16.msra.mxu1 %v2478_v60  ;;  %v2141_v60 = vld [vmem:[%s3265_s12] ss:$0 sm:$0xff] }
 0x45f   :  { %2511 = vpow2.f32 %v679_v1  ;;  %v681_v5 = vmul.f32 1.442695, %v678_v2  ;;  %2290 = vmatpush3.bf16.msra.mxu0 %v296_v3  ;;  %415 = vadd.xlane.f32.xlu0 %v414_v4 }
 0x460   :  { %2301 = vmatprep.subr.bf16.mxu0 %v2686_v15  ;;  %2347 = vmatprep.subr.bf16.mxu1 %v2686_v15 }
 0x461   :  { %v2508_v6 = vpop.eup %2507  ;;  %2513 = vpow2.f32 %v681_v5 }
 0x462   :  { %v547_v7 = vsel %vm271_vm3, %v2508_v6, 0.0 }
 0x463   :  { %v2510_v8 = vpop.eup %2509  ;;  %548 = vadd.xlane.f32.xlu1 %v547_v7 }
 0x464   :  { %v550_v9 = vsel %vm271_vm3, %v2510_v8, 0.0 }
 0x465   :  { %551 = vadd.xlane.f32.xlu0 %v550_v9 }
 0x469   :  { %v2512_v10 = vpop.eup %2511 }
 0x46a   :  { %v683_v11 = vsel %vm271_vm3, %v2512_v10, 0.0 }
 0x46b   :  { %v2514_v12 = vpop.eup %2513  ;;  %684 = vadd.xlane.f32.xlu1 %v683_v11 }
 0x46c   :  { %v686_v13 = vsel %vm271_vm3, %v2514_v12, 0.0 }
 0x46d   :  { %687 = vadd.xlane.f32.xlu0 %v686_v13  ;;  %v2135_v13 = vld [vmem:[%s3261_s8] ss:$0 sm:$0xff] }
 0x47c   :  { %558 = vrot.lane.b32.xlu1 %v2871_v41, %s2696_s18 }
 0x480   :  { %694 = vrot.lane.b32.xlu1 %v2871_v41, %s3280_s4 }
 0x483   :  { %422 = vrot.lane.b32.xlu0 %v2871_v41, %s2698_s25 }
 0x4e0   :  { %v286_v14 = vpop.xlane.xlu1 %285 }
 0x4e1   :  { %2515 = vrcp.f32 %v286_v14 }
 0x4e2   :  { %v289_v16 = vpop.xlane.xlu0 %288 }
 0x4e3   :  { %2517 = vrcp.f32 %v289_v16 }
 0x4e8   :  { %v413_v20 = vpop.xlane.xlu1 %412 }
 0x4eb   :  { %v2516_v17 = vpop.eup %2515 }
 0x4ec   :  { %v416_v18 = vpop.xlane.xlu0 %415  ;;  %v292_v21 = vmul.f32 %v2516_v17, %v2500_v46 }
 0x4ed   :  { %v2518_v19 = vpop.eup %2517  ;;  %2519 = vrcp.f32 %v416_v18 }
 0x4ee   :  { %v293_v22 = vmul.f32 %v2518_v19, %v2502_v50  ;;  %2521 = vrcp.f32 %v413_v20 }
 0x4f0   :  { %v294_v23 = vpack.c.bf16 %v293_v22, %v292_v21  ;;  %v549_v41 = vpop.xlane.xlu1 %548 }
 0x4f2   :  { %2292 = vmatmul.mubr.msk.bf16.vlgmr.msra.gmra.mrb[0].mxu0 %vm271_vm3, %v294_v23  ;;  %v552_v24 = vpop.xlane.xlu0 %551 }
 0x4f3   :  { %2303 = vmatprep.mubr.msk.bf16.mxu0 %vm2687_vm1, %v2686_v15  ;;  %2523 = vrcp.f32 %v552_v24 }
 0x4f4   :  { %2525 = vrcp.f32 %v549_v41 }
 0x4f7   :  { %v2520_v25 = vpop.eup %2519 }
 0x4f8   :  { %v2522_v27 = vpop.eup %2521  ;;  %v420_v28 = vmul.f32 %v2520_v25, %v2506_v0  ;;  %v685_v29 = vpop.xlane.xlu1 %684 }
 0x4f9   :  { %v419_v30 = vmul.f32 %v2522_v27, %v2504_v59 }
 0x4fa   :  { %v688_v26 = vpop.xlane.xlu0 %687 }
 0x4fb   :  { %2527 = vrcp.f32 %v688_v26  ;;  %v421_v34 = vpack.c.bf16 %v420_v28, %v419_v30 }
 0x4fc   :  { %2529 = vrcp.f32 %v685_v29  ;;  %v559_v36 = vpop.permute.xlu1 %558 }
 0x4fd   :  { %v2524_v35 = vpop.eup %2523 }
 0x4fe   :  { %v423_v33 = vpop.permute.xlu0 %422  ;;  %v2526_v37 = vpop.eup %2525  ;;  %v556_v38 = vmul.f32 %v2524_v35, %v2510_v8  ;;  %v2480_v35 = vld [vmem:[%s3264_s11 + $0x8] sm:$0xff]  }
 0x4ff   :  { %2302 = vmatpush3.bf16.msra.mxu0 %v423_v33  ;;  %v555_v39 = vmul.f32 %v2526_v37, %v2508_v6 }
 0x500   :  { %2313 = vmatprep.subr.bf16.mxu0 %v2686_v15  ;;  %v695_v43 = vpop.permute.xlu1 %694 }
 0x501   :  { %v557_v40 = vpack.c.bf16 %v556_v38, %v555_v39 }
 0x502   :  { %2304 = vmatmul.mubr.msk.bf16.vlgmr.msra.gmra.mrb[4].mxu0 %vm271_vm3, %v421_v34 }
 0x503   :  { %2314 = vmatpush3.bf16.msra.mxu0 %v559_v36  ;;  %2315 = vmatprep.mubr.msk.bf16.mxu0 %vm2687_vm1, %v2686_v15 }
 0x504   :  { %2325 = vmatprep.subr.bf16.mxu0 %v2686_v15 }
 0x505   :  { %v2528_v42 = vpop.eup %2527 }
 0x506   :  { %v2530_v44 = vpop.eup %2529  ;;  %v692_v45 = vmul.f32 %v2528_v42, %v2514_v12 }
 0x507   :  { %v691_v46 = vmul.f32 %v2530_v44, %v2512_v10 }
 0x509   :  { %v693_v47 = vpack.c.bf16 %v692_v45, %v691_v46  ;;  %v2139_v45 = vld [vmem:[%s3262_s9] ss:$0 sm:$0xff] }
 0x50a   :  { %2316 = vmatmul.mubr.msk.bf16.vlgmr.msra.gmra.mrb[8].mxu0 %vm271_vm3, %v557_v40 }
 0x50b   :  { %2326 = vmatpush3.bf16.msra.mxu0 %v695_v43  ;;  %2327 = vmatprep.mubr.msk.bf16.mxu0 %vm2687_vm1, %v2686_v15 }
 0x50c   :  { %2339 = vmatprep.subr.bf16.mxu0 %v2686_v15 }
 0x512   :  { %2328 = vmatmul.mubr.msk.bf16.vlgmr.msra.gmra.mrb[12].mxu0 %vm271_vm3, %v693_v47 }
 0x513   :  { %2343 = vmatprep.mubr.msk.bf16.mxu0 %vm2687_vm1, %v2686_v15 }
 0x5c5   :  { %v335_v48 = vpop.f32.mrb[0].mxu0 }
 0x5c6   :  { %342 = vst.msk [vmem:[#allocation2] sm:$0xff] %vm219_vm2, %v335_v48  ;;  %v2293_v49 = vpop.f32.mrb[1].mxu0 }
 0x5c7   :  { %v338_v50 = vpop.f32.mrb[2].mxu0  ;;  %v2140_v49 = vld [vmem:[%s3263_s10] ss:$0 sm:$0xff] }
 0x5c8   :  { %343 = vst.msk [vmem:[#allocation2 + $0x8] sm:$0xff] %vm219_vm2, %v338_v50  ;;  %v2294_v51 = vpop.f32.mrb[3].mxu0 }
 0x5d5   :  { %v462_v52 = vpop.f32.mrb[4].mxu0 }
 0x5d6   :  { %471 = vrot.lane.b32.xlu1 %v462_v52, %s3278_s23  ;;  %v2305_v53 = vpop.f32.mrb[5].mxu0 }
 0x5d7   :  { %v465_v55 = vpop.f32.mrb[6].mxu0 }
 0x5d8   :  { %473 = vrot.lane.b32.xlu0 %v465_v55, %s3278_s23  ;;  %v2306_v56 = vpop.f32.mrb[7].mxu0  ;;  %v2481_v55 = vld [vmem:[%s3266_s13] sm:$0xff]  }
 0x5d9   :  { %v2482_v56 = vld [vmem:[%s3266_s13 + $0x8] sm:$0xff]  }
 0x5dd   :  { %v598_v59 = vpop.f32.mrb[8].mxu0 }
 0x5de   :  { %607 = vrot.lane.b32.xlu1 %v598_v59, %s3276_s29  ;;  %v2317_v61 = vpop.f32.mrb[9].mxu0  ;;  %v2484_v59 = vld [vmem:[%s3266_s13 + $0x18] sm:$0xff]  }
 0x5df   :  { %v601_v62 = vpop.f32.mrb[10].mxu0 }
 0x5e0   :  { %609 = vrot.lane.b32.xlu0 %v601_v62, %s3276_s29  ;;  %v2318_v63 = vpop.f32.mrb[11].mxu0 }
 0x5e5   :  { %v734_v0 = vpop.f32.mrb[12].mxu0 }
 0x5e6   :  { %743 = vrot.lane.b32.xlu1 %v734_v0, %s3274_s30  ;;  %v2329_v1 = vpop.f32.mrb[13].mxu0 }
 0x5e7   :  { %v737_v2 = vpop.f32.mrb[14].mxu0 }
 0x5e8   :  { %745 = vrot.lane.b32.xlu0 %v737_v2, %s3274_s30  ;;  %v2330_v3 = vpop.f32.mrb[15].mxu0 }
 0x648   :  { %v472_v4 = vpop.permute.xlu1 %471 }
 0x649   :  { %478 = vst.msk [vmem:[#allocation2] sm:$0xff] %vm477_vm4, %v472_v4 }
 0x64a   :  { %v474_v5 = vpop.permute.xlu0 %473 }
 0x64b   :  { %479 = vst.msk [vmem:[#allocation2 + $0x8] sm:$0xff] %vm477_vm4, %v474_v5 }
 0x650   :  { %v608_v6 = vpop.permute.xlu1 %607 }
 0x651   :  { %614 = vst.msk [vmem:[#allocation2] sm:$0xff] %vm613_vm5, %v608_v6 }
 0x652   :  { %v610_v7 = vpop.permute.xlu0 %609 }
 0x653   :  { %615 = vst.msk [vmem:[#allocation2 + $0x8] sm:$0xff] %vm613_vm5, %v610_v7 }
 0x658   :  { %v744_v8 = vpop.permute.xlu1 %743 }
 0x659   :  { %750 = vst.msk [vmem:[#allocation2] sm:$0xff] %vm749_vm6, %v744_v8 }
 0x65a   :  { %v746_v9 = vpop.permute.xlu0 %745 }
 0x65b   :  { %751 = vst.msk [vmem:[#allocation2 + $0x8] sm:$0xff] %vm749_vm6, %v746_v9 }
 0x660   :  { %v752_v10 = vld [vmem:[#allocation2] sm:$0xff] }
 0x662   :  { %v753_v11 = vld [vmem:[#allocation2 + $0x8] sm:$0xff] }
 0x663   :  { %v754_v12 = vpack.c.bf16 %v753_v11, %v752_v10 }
 0x665   :  { %2336 = vmatmul.mubr.msk.bf16.vlgmr.msra.gmra.mrb[20].mxu1 %vm101_vm0, %v754_v12 }
 0x666   :  { %2355 = vmatprep.mubr.msk.bf16.mxu1 %vm2687_vm1, %v2686_v15  ;;  %2348 = vmatpush3.bf16.msra.mxu1 %v2481_v55 }
 0x667   :  { %2349 = vmatprep.subr.bf16.mxu1 %v2686_v15 }
 0x66a   :  { %2350 = vmatpush3.bf16.msra.mxu1 %v2482_v56 }
 0x66b   :  { %2351 = vmatprep.subr.bf16.mxu1 %v2686_v15 }
 0x66e   :  { %2352 = vmatpush3.bf16.msra.mxu1 %v2483_v57 }
 0x66f   :  { %2353 = vmatprep.subr.bf16.mxu1 %v2686_v15 }
 0x672   :  { %2354 = vmatpush3.bf16.msra.mxu1 %v2484_v59 }
 0x673   :  { %2373 = vmatprep.subr.bf16.mxu1 %v2686_v15 }
 0x738   :  { %v815_v14 = vpop.f32.mrb[20].mxu1 }
 0x739   :  { %v816_v16 = vadd.f32 %v2135_v13, %v815_v14  ;;  %v2337_v17 = vpop.f32.mrb[21].mxu1 }
 0x73a   :  { %v818_v18 = vpop.f32.mrb[22].mxu1 }
 0x73b   :  { %v819_v19 = vadd.f32 %v2135_v13, %v818_v18  ;;  %v2338_v20 = vpop.f32.mrb[23].mxu1  ;;  %v822_v21 = vadd.f32 %v816_v16, %v2859_v31 }
 0x73d   :  { %v826_v22 = vsel %vm101_vm0, %v822_v21, 0.0  ;;  %v823_v23 = vadd.f32 %v819_v19, %v2861_v32  ;;  %v2479_v32 = vld [vmem:[%s3264_s11] sm:$0xff]  }
 0x73e   :  { %827 = vadd.xlane.f32.xlu1 %v826_v22  ;;  %2340 = vmatpush3.bf16.msra.mxu0 %v2479_v32 }
 0x73f   :  { %v829_v24 = vsel %vm101_vm0, %v823_v23, 0.0  ;;  %2341 = vmatprep.subr.bf16.mxu0 %v2686_v15 }
 0x740   :  { %830 = vadd.xlane.f32.xlu0 %v829_v24 }
 0x742   :  { %2342 = vmatpush3.bf16.msra.mxu0 %v2480_v35 }
 0x743   :  { %2359 = vmatprep.subr.bf16.mxu0 %v2686_v15 }
 0x7cb   :  { %v828_v41 = vpop.xlane.xlu1 %827 }
 0x7cc   :  { %v832_v25 = vmul.f32 0.03125, %v828_v41 }
 0x7cd   :  { %v831_v26 = vpop.xlane.xlu0 %830 }
 0x7ce   :  { %v834_v27 = vsub.f32 %v822_v21, %v832_v25  ;;  %v833_v28 = vmul.f32 0.03125, %v831_v26 }
 0x7d0   :  { %v835_v29 = vsub.f32 %v823_v23, %v833_v28  ;;  %v836_v30 = vmul.f32 %v834_v27, %v834_v27  ;;  %v2145_v23 = vld [vmem:[%s3267_s14] ss:$0 sm:$0xff] }
 0x7d2   :  { %v838_v33 = vsel %vm101_vm0, %v836_v30, 0.0  ;;  %v837_v34 = vmul.f32 %v835_v29, %v835_v29 }
 0x7d3   :  { %839 = vadd.xlane.f32.xlu0 %v838_v33 }
 0x7d4   :  { %v841_v31 = vsel %vm101_vm0, %v837_v34, 0.0 }
 0x7d7   :  { %842 = vadd.xlane.f32.xlu0 %v841_v31 }
 0x860   :  { %v840_v36 = vpop.xlane.xlu0 %839 }
 0x861   :  { %v844_v37 = vmul.f32 0.03125, %v840_v36 }
 0x863   :  { %v846_v38 = vadd.f32 1e-12, %v844_v37 }
 0x864   :  { %v843_v39 = vpop.xlane.xlu0 %842 }
 0x865   :  { %2531 = vrsqrt.f32 %v846_v38  ;;  %v845_v40 = vmul.f32 0.03125, %v843_v39 }
 0x867   :  { %v847_v42 = vadd.f32 1e-12, %v845_v40 }
 0x869   :  { %2533 = vrsqrt.f32 %v847_v42 }
 0x86f   :  { %v2532_v43 = vpop.eup %2531 }
 0x870   :  { %v850_v44 = vmul.f32 %v2532_v43, %v834_v27 }
 0x872   :  { %v858_v47 = vmul.f32 %v2139_v45, %v850_v44  ;;  %v2485_v44 = vld [vmem:[%s3258_s5 + $0x10] sm:$0xff]  }
 0x873   :  { %v2534_v46 = vpop.eup %2533 }
 0x874   :  { %v851_v48 = vmul.f32 %v2534_v46, %v835_v29  ;;  %v866_v51 = vadd.f32 %v2140_v49, %v858_v47 }
 0x876   :  { %v859_v50 = vmul.f32 %v2139_v45, %v851_v48  ;;  %v2486_v45 = vld [vmem:[%s3258_s5 + $0x18] sm:$0xff]  }
 0x878   :  { %v867_v52 = vadd.f32 %v2140_v49, %v859_v50 }
 0x87a   :  { %v868_v53 = vpack.c.bf16 %v867_v52, %v866_v51 }
 0x87c   :  { %2344 = vmatmul.mubr.msk.bf16.vlgmr.msra.gmra.mrb[16].mxu0 %vm101_vm0, %v868_v53  ;;  %v2151_v53 = vld [vmem:[%s3268_s15] ss:$0 sm:$0xff] }
 0x87d   :  { %2363 = vmatprep.mubr.msk.bf16.mxu0 %vm2687_vm1, %v2686_v15  ;;  %2360 = vmatpush3.bf16.msra.mxu0 %v2485_v44 }
 0x87e   :  { %2361 = vmatprep.subr.bf16.mxu0 %v2686_v15 }
 0x881   :  { %2362 = vmatpush3.bf16.msra.mxu0 %v2486_v45 }
 0x882   :  { %2367 = vmatprep.subr.bf16.mxu0 %v2686_v15 }
 0x94f   :  { %v929_v61 = vpop.f32.mrb[16].mxu0 }
 0x950   :  { %v930_v62 = vadd.f32 %v2141_v60, %v929_v61  ;;  %v2345_v63 = vpop.f32.mrb[17].mxu0 }
 0x951   :  { %v932_v0 = vpop.f32.mrb[18].mxu0 }
 0x952   :  { %v938_v1 = vmul.f32 0.044715, %v930_v62  ;;  %v933_v2 = vadd.f32 %v2141_v60, %v932_v0  ;;  %v2346_v3 = vpop.f32.mrb[19].mxu0  ;;  %v936_v17 = vmul.f32 0.5, %v930_v62  ;;  %v2152_v60 = vld [vmem:[%s3269_s16] ss:$0 sm:$0xff] }
 0x954   :  { %v940_v4 = vmul.f32 %v938_v1, %v930_v62  ;;  %v939_v5 = vmul.f32 0.044715, %v933_v2  ;;  %v937_v18 = vmul.f32 0.5, %v933_v2  ;;  %v2158_v1 = vld [vmem:[%s3259_s6 + $0x1] ss:$0 sm:$0xff]  ;;  %s3286_s6 = smov 40  }
 0x956   :  { %v942_v6 = vmul.f32 %v940_v4, %v930_v62  ;;  %v941_v7 = vmul.f32 %v939_v5, %v933_v2 }
 0x958   :  { %v944_v8 = vadd.f32 %v942_v6, %v930_v62  ;;  %v943_v9 = vmul.f32 %v941_v7, %v933_v2 }
 0x95a   :  { %v946_v10 = vmul.f32 0.7978846, %v944_v8  ;;  %v945_v11 = vadd.f32 %v943_v9, %v933_v2 }
 0x95c   :  { %2535 = vtanh.f32 %v946_v10  ;;  %v947_v12 = vmul.f32 0.7978846, %v945_v11 }
 0x95e   :  { %2537 = vtanh.f32 %v947_v12 }
 0x966   :  { %v2536_v13 = vpop.eup %2535 }
 0x967   :  { %v950_v14 = vadd.f32 1.0, %v2536_v13 }
 0x968   :  { %v2538_v16 = vpop.eup %2537 }
 0x969   :  { %v951_v19 = vadd.f32 1.0, %v2538_v16  ;;  %v952_v20 = vmul.f32 %v950_v14, %v936_v17 }
 0x96b   :  { %v953_v21 = vmul.f32 %v951_v19, %v937_v18 }
 0x96d   :  { %v954_v22 = vpack.c.bf16 %v953_v21, %v952_v20 }
 0x96f   :  { %2356 = vmatmul.mubr.msk.bf16.vlgmr.msra.gmra.mrb[24].mxu1 %vm994_vm7, %v954_v22 }
 0x970   :  { %2375 = vmatprep.mubr.msk.bf16.mxu1 %vm2687_vm1, %v2686_v15 }
 0xa42   :  { %v1032_v24 = vpop.f32.mrb[24].mxu1 }
 0xa43   :  { %v1033_v41 = vadd.f32 %v2145_v23, %v1032_v24  ;;  %v2357_v25 = vpop.f32.mrb[25].mxu1 }
 0xa44   :  { %v1035_v26 = vpop.f32.mrb[26].mxu1 }
 0xa45   :  { %v1036_v27 = vadd.f32 %v2145_v23, %v1035_v26  ;;  %v2358_v28 = vpop.f32.mrb[27].mxu1  ;;  %v1039_v29 = vadd.f32 %v1033_v41, %v866_v51 }
 0xa47   :  { %v1043_v30 = vsel %vm101_vm0, %v1039_v29, 0.0  ;;  %v1040_v33 = vadd.f32 %v1036_v27, %v867_v52 }
 0xa48   :  { %1044 = vadd.xlane.f32.xlu1 %v1043_v30 }
 0xa49   :  { %v1046_v34 = vsel %vm101_vm0, %v1040_v33, 0.0 }
 0xa4a   :  { %1047 = vadd.xlane.f32.xlu0 %v1046_v34 }
 0xad5   :  { %v1045_v31 = vpop.xlane.xlu1 %1044 }
 0xad6   :  { %v1049_v32 = vmul.f32 0.03125, %v1045_v31 }
 0xad7   :  { %v1048_v35 = vpop.xlane.xlu0 %1047 }
 0xad8   :  { %v1051_v36 = vsub.f32 %v1039_v29, %v1049_v32  ;;  %v1050_v37 = vmul.f32 0.03125, %v1048_v35 }
 0xada   :  { %v1052_v38 = vsub.f32 %v1040_v33, %v1050_v37  ;;  %v1053_v39 = vmul.f32 %v1051_v36, %v1051_v36 }
 0xadc   :  { %v1055_v40 = vsel %vm101_vm0, %v1053_v39, 0.0  ;;  %v1054_v42 = vmul.f32 %v1052_v38, %v1052_v38 }
 0xadd   :  { %1056 = vadd.xlane.f32.xlu1 %v1055_v40 }
 0xade   :  { %v1058_v43 = vsel %vm101_vm0, %v1054_v42, 0.0 }
 0xadf   :  { %1059 = vadd.xlane.f32.xlu0 %v1058_v43 }
 0xb6a   :  { %v1057_v46 = vpop.xlane.xlu1 %1056 }
 0xb6b   :  { %v1061_v47 = vmul.f32 0.03125, %v1057_v46 }
 0xb6c   :  { %v1060_v48 = vpop.xlane.xlu0 %1059 }
 0xb6d   :  { %v1063_v49 = vadd.f32 1e-12, %v1061_v47  ;;  %v1062_v50 = vmul.f32 0.03125, %v1060_v48 }
 0xb6f   :  { %2539 = vrsqrt.f32 %v1063_v49  ;;  %v1064_v51 = vadd.f32 1e-12, %v1062_v50 }
 0xb71   :  { %2541 = vrsqrt.f32 %v1064_v51 }
 0xb79   :  { %v2540_v52 = vpop.eup %2539 }
 0xb7a   :  { %v1067_v55 = vmul.f32 %v2540_v52, %v1051_v36 }
 0xb7b   :  { %v2542_v56 = vpop.eup %2541 }
 0xb7c   :  { %v1075_v57 = vmul.f32 %v2151_v53, %v1067_v55  ;;  %v1068_v59 = vmul.f32 %v2542_v56, %v1052_v38 }
 0xb7e   :  { %v1076_v61 = vmul.f32 %v2151_v53, %v1068_v59  ;;  %v3054_v62 = vadd.f32 %v2152_v60, %v1075_v57 }
 0xb80   :  { %v3056_v63 = vadd.f32 %v2152_v60, %v1076_v61 }
 0xb82   :  { %v1085_v0 = vpack.c.bf16 %v3056_v63, %v3054_v62 }
 0xb84   :  { %2364 = vmatmul.mubr.msk.bf16.vlgmr.msra.gmra.mrb[20].mxu0 %vm101_vm0, %v1085_v0 }
 0xb85   :  { %2369 = vmatprep.mubr.msk.bf16.mxu0 %vm2687_vm1, %v2686_v15 }
 0xc57   :  { %v1148_v2 = vpop.f32.mrb[20].mxu0 }
 0xc58   :  { %v2365_v3 = vpop.f32.mrb[21].mxu0  ;;  %v1149_v5 = vadd.f32 %v2158_v1, %v1148_v2 }
 0xc59   :  { %v1151_v4 = vpop.f32.mrb[22].mxu0 }
 0xc5a   :  { %v1152_v6 = vadd.f32 %v2158_v1, %v1151_v4  ;;  %v2366_v7 = vpop.f32.mrb[23].mxu0 }
 0xc5c   :  { %v3066_v8 = vpack.c.bf16 %v1152_v6, %v1149_v5 }
 0xc5e   :  { %1284 = vrot.lane.b32.xlu0 %v3066_v8, %s2688_s3  ;;  %1157 = vrot.lane.b32.xlu1 %v3066_v8, %s2689_s19  ;;  %s3287_s3 = smov 8   ;;  %s3288_s19 = smov 16  }
 0xc62   :  { %1554 = vrot.lane.b32.xlu0 %v3066_v8, %s2694_s27  ;;  %1282 = vrot.lane.b32.xlu1 %v3066_v8, %s2690_s1  ;;  %s3289_s27 = smov 24  }
 0xc66   :  { %1419 = vrot.lane.b32.xlu1 %v3066_v8, %s2692_s20 }
 0xc6a   :  { %1417 = vrot.lane.b32.xlu1 %v3066_v8, %s2691_s17 }
 0xc6e   :  { %1552 = vrot.lane.b32.xlu1 %v3066_v8, %s2693_s21 }
 0xcd0   :  { %v1158_v9 = vpop.permute.xlu1 %1157  ;;  %v1285_v11 = vpop.permute.xlu0 %1284 }
 0xcd1   :  { %v1163_v10 = vsel %vm219_vm2, %v1158_v9, 0  ;;  %v1290_v13 = vsel %vm219_vm2, %v1285_v11, 0 }
 0xcd2   :  { %2368 = vmatpush3.bf16.xpose.msra.mxu0 %v1163_v10 }
 0xcd3   :  { %2379 = vmatprep.subr.bf16.mxu0 %v2686_v15 }
 0xcd4   :  { %v1283_v12 = vpop.permute.xlu1 %1282  ;;  %v1555_v17 = vpop.permute.xlu0 %1554 }
 0xcd5   :  { %v1560_v19 = vsel %vm219_vm2, %v1555_v17, 0 }
 0xcd8   :  { %v1420_v14 = vpop.permute.xlu1 %1419 }
 0xcd9   :  { %2370 = vmatmul.mubr.msk.bf16.vlgmr.msra.gmra.mrb[24].mxu0 %vm219_vm2, %v3066_v8  ;;  %v1425_v16 = vsel %vm219_vm2, %v1420_v14, 0 }
 0xcda   :  { %2380 = vmatpush3.bf16.xpose.msra.mxu0 %v1290_v13  ;;  %2381 = vmatprep.mubr.msk.bf16.mxu0 %vm2687_vm1, %v2686_v15 }
 0xcdb   :  { %2391 = vmatprep.subr.bf16.mxu0 %v2686_v15 }
 0xcdc   :  { %v1418_v18 = vpop.permute.xlu1 %1417 }
 0xce0   :  { %v1553_v20 = vpop.permute.xlu1 %1552 }
 0xce1   :  { %2382 = vmatmul.mubr.msk.bf16.vlgmr.msra.gmra.mrb[28].mxu0 %vm219_vm2, %v1283_v12 }
 0xce2   :  { %2392 = vmatpush3.bf16.xpose.msra.mxu0 %v1425_v16  ;;  %2393 = vmatprep.mubr.msk.bf16.mxu0 %vm2687_vm1, %v2686_v15 }
 0xce3   :  { %2403 = vmatprep.subr.bf16.mxu0 %v2686_v15 }
 0xce9   :  { %2394 = vmatmul.mubr.msk.bf16.vlgmr.msra.gmra.mrb[32].mxu0 %vm219_vm2, %v1418_v18 }
 0xcea   :  { %2404 = vmatpush3.bf16.xpose.msra.mxu0 %v1560_v19  ;;  %2405 = vmatprep.mubr.msk.bf16.mxu0 %vm2687_vm1, %v2686_v15 }
 0xceb   :  { %2415 = vmatprep.subr.bf16.mxu0 %v2686_v15 }
 0xcf1   :  { %2406 = vmatmul.mubr.msk.bf16.vlgmr.msra.gmra.mrb[36].mxu0 %vm219_vm2, %v1553_v20 }
 0xcf2   :  { %2419 = vmatprep.mubr.msk.bf16.mxu0 %vm2687_vm1, %v2686_v15 }
 0xdac   :  { %v1199_v21 = vpop.f32.mrb[24].mxu0 }
 0xdad   :  { %v1206_v22 = vmul.f32 0.35355338, %v1199_v21  ;;  %v2371_v23 = vpop.f32.mrb[25].mxu0 }
 0xdae   :  { %v1202_v24 = vpop.f32.mrb[26].mxu0 }
 0xdaf   :  { %v1207_v41 = vmul.f32 0.35355338, %v1202_v24  ;;  %v2372_v25 = vpop.f32.mrb[27].mxu0  ;;  %v1208_v26 = vadd.f32 %v1206_v22, %v2908_v54 }
 0xdb1   :  { %v1210_v27 = vsel %vm271_vm3, %v1208_v26, -inf  ;;  %v1209_v28 = vadd.f32 %v1207_v41, %v2910_v58 }
 0xdb2   :  { %1211 = vmax.xlane.f32.xlu0 %v1210_v27 }
 0xdb3   :  { %v1213_v29 = vsel %vm271_vm3, %v1209_v28, -inf }
 0xdb4   :  { %1214 = vmax.xlane.f32.xlu1 %v1213_v29  ;;  %v1326_v30 = vpop.f32.mrb[28].mxu0 }
 0xdb5   :  { %v1333_v33 = vmul.f32 0.35355338, %v1326_v30  ;;  %v2383_v34 = vpop.f32.mrb[29].mxu0 }
 0xdb6   :  { %v1329_v31 = vpop.f32.mrb[30].mxu0 }
 0xdb7   :  { %v1334_v32 = vmul.f32 0.35355338, %v1329_v31  ;;  %v2384_v35 = vpop.f32.mrb[31].mxu0  ;;  %v1335_v36 = vadd.f32 %v1333_v33, %v2908_v54 }
 0xdb9   :  { %v1337_v37 = vsel %vm271_vm3, %v1335_v36, -inf  ;;  %v1336_v38 = vadd.f32 %v1334_v32, %v2910_v58 }
 0xdba   :  { %1338 = vmax.xlane.f32.xlu0 %v1337_v37 }
 0xdbb   :  { %v1340_v43 = vsel %vm271_vm3, %v1336_v38, -inf }
 0xdbc   :  { %v1461_v39 = vpop.f32.mrb[32].mxu0 }
 0xdbd   :  { %v1468_v40 = vmul.f32 0.35355338, %v1461_v39  ;;  %v2395_v42 = vpop.f32.mrb[33].mxu0 }
 0xdbe   :  { %1341 = vmax.xlane.f32.xlu0 %v1340_v43  ;;  %v1464_v44 = vpop.f32.mrb[34].mxu0 }
 0xdbf   :  { %v1469_v45 = vmul.f32 0.35355338, %v1464_v44  ;;  %v2396_v46 = vpop.f32.mrb[35].mxu0  ;;  %v1470_v47 = vadd.f32 %v1468_v40, %v2908_v54 }
 0xdc1   :  { %v1472_v48 = vsel %vm271_vm3, %v1470_v47, -inf  ;;  %v1471_v49 = vadd.f32 %v1469_v45, %v2910_v58 }
 0xdc2   :  { %1473 = vmax.xlane.f32.xlu0 %v1472_v48 }
 0xdc3   :  { %v1475_v50 = vsel %vm271_vm3, %v1471_v49, -inf }
 0xdc4   :  { %1476 = vmax.xlane.f32.xlu1 %v1475_v50  ;;  %v1596_v51 = vpop.f32.mrb[36].mxu0 }
 0xdc5   :  { %v1603_v52 = vmul.f32 0.35355338, %v1596_v51  ;;  %v2407_v53 = vpop.f32.mrb[37].mxu0 }
 0xdc6   :  { %v1599_v55 = vpop.f32.mrb[38].mxu0 }
 0xdc7   :  { %v1604_v56 = vmul.f32 0.35355338, %v1599_v55  ;;  %v2408_v57 = vpop.f32.mrb[39].mxu0  ;;  %v1605_v59 = vadd.f32 %v1603_v52, %v2908_v54 }
 0xdc9   :  { %v1607_v60 = vsel %vm271_vm3, %v1605_v59, -inf  ;;  %v1606_v61 = vadd.f32 %v1604_v56, %v2910_v58 }
 0xdca   :  { %1608 = vmax.xlane.f32.xlu0 %v1607_v60 }
 0xdcb   :  { %v1610_v0 = vsel %vm271_vm3, %v1606_v61, -inf }
 0xdcc   :  { %1611 = vmax.xlane.f32.xlu1 %v1610_v0 }
 0xe3f   :  { %v1212_v1 = vpop.xlane.xlu0 %1211 }
 0xe40   :  { %v1216_v2 = vsub.f32 %v1208_v26, %v1212_v1 }
 0xe41   :  { %v1215_v3 = vpop.xlane.xlu1 %1214 }
 0xe42   :  { %v1218_v4 = vmul.f32 1.442695, %v1216_v2  ;;  %v1217_v5 = vsub.f32 %v1209_v28, %v1215_v3 }
 0xe44   :  { %2543 = vpow2.f32 %v1218_v4  ;;  %v1220_v6 = vmul.f32 1.442695, %v1217_v5 }
 0xe46   :  { %2545 = vpow2.f32 %v1220_v6 }
 0xe47   :  { %v1339_v7 = vpop.xlane.xlu0 %1338 }
 0xe48   :  { %v1343_v9 = vsub.f32 %v1335_v36, %v1339_v7 }
 0xe4a   :  { %v1345_v10 = vmul.f32 1.442695, %v1343_v9 }
 0xe4b   :  { %v1342_v54 = vpop.xlane.xlu0 %1341 }
 0xe4c   :  { %2547 = vpow2.f32 %v1345_v10  ;;  %v1344_v11 = vsub.f32 %v1336_v38, %v1342_v54 }
 0xe4e   :  { %v2544_v12 = vpop.eup %2543  ;;  %v1347_v58 = vmul.f32 1.442695, %v1344_v11 }
 0xe4f   :  { %v1474_v13 = vpop.xlane.xlu0 %1473  ;;  %v1222_v14 = vsel %vm271_vm3, %v2544_v12, 0.0 }
 0xe50   :  { %v2546_v16 = vpop.eup %2545  ;;  %2549 = vpow2.f32 %v1347_v58  ;;  %v1478_v17 = vsub.f32 %v1470_v47, %v1474_v13  ;;  %1223 = vadd.xlane.f32.xlu0 %v1222_v14 }
 0xe51   :  { %v1477_v18 = vpop.xlane.xlu1 %1476  ;;  %v1225_v19 = vsel %vm271_vm3, %v2546_v16, 0.0 }
 0xe52   :  { %v1480_v20 = vmul.f32 1.442695, %v1478_v17  ;;  %v1479_v21 = vsub.f32 %v1471_v49, %v1477_v18  ;;  %1226 = vadd.xlane.f32.xlu1 %v1225_v19 }
 0xe54   :  { %2551 = vpow2.f32 %v1480_v20  ;;  %v1482_v22 = vmul.f32 1.442695, %v1479_v21 }
 0xe56   :  { %v2548_v23 = vpop.eup %2547  ;;  %2553 = vpow2.f32 %v1482_v22 }
 0xe57   :  { %v1609_v24 = vpop.xlane.xlu0 %1608  ;;  %v1349_v41 = vsel %vm271_vm3, %v2548_v23, 0.0 }
 0xe58   :  { %v1613_v25 = vsub.f32 %v1605_v59, %v1609_v24  ;;  %1350 = vadd.xlane.f32.xlu0 %v1349_v41  ;;  %v2487_v24 = vld [vmem:[%s3260_s7 + $0x10] sm:$0xff]   ;;  %v2488_v41 = vld [vmem:[%s3260_s7 + $0x18] sm:$0xff]  }
 0xe59   :  { %v1612_v35 = vpop.xlane.xlu1 %1611  ;;  %2416 = vmatpush3.bf16.msra.mxu0 %v2487_v24 }
 0xe5a   :  { %v2550_v26 = vpop.eup %2549  ;;  %v1615_v27 = vmul.f32 1.442695, %v1613_v25  ;;  %v1614_v36 = vsub.f32 %v1606_v61, %v1612_v35  ;;  %2417 = vmatprep.subr.bf16.mxu0 %v2686_v15 }
 0xe5b   :  { %v1352_v28 = vsel %vm271_vm3, %v2550_v26, 0.0 }
 0xe5c   :  { %2555 = vpow2.f32 %v1615_v27  ;;  %1353 = vadd.xlane.f32.xlu1 %v1352_v28  ;;  %v1617_v37 = vmul.f32 1.442695, %v1614_v36 }
 0xe5d   :  { %2418 = vmatpush3.bf16.msra.mxu0 %v2488_v41 }
 0xe5e   :  { %v2552_v29 = vpop.eup %2551  ;;  %2557 = vpow2.f32 %v1617_v37  ;;  %2431 = vmatprep.subr.bf16.mxu0 %v2686_v15 }
 0xe5f   :  { %v1484_v30 = vsel %vm271_vm3, %v2552_v29, 0.0 }
 0xe60   :  { %v2554_v33 = vpop.eup %2553  ;;  %1485 = vadd.xlane.f32.xlu0 %v1484_v30 }
 0xe61   :  { %v1487_v34 = vsel %vm271_vm3, %v2554_v33, 0.0 }
 0xe62   :  { %1488 = vadd.xlane.f32.xlu1 %v1487_v34 }
 0xe66   :  { %v3125_v31 = vpop.eup %2555 }
 0xe67   :  { %v1619_v32 = vsel %vm271_vm3, %v3125_v31, 0.0 }
 0xe68   :  { %1620 = vadd.xlane.f32.xlu0 %v1619_v32  ;;  %v2558_v38 = vpop.eup %2557 }
 0xe69   :  { %v1622_v39 = vsel %vm271_vm3, %v2558_v38, 0.0 }
 0xe73   :  { %1360 = vrot.lane.b32.xlu1 %v3066_v8, %s2698_s25 }
 0xe77   :  { %1495 = vrot.lane.b32.xlu1 %v3066_v8, %s2696_s18 }
 0xe7e   :  { %1233 = vrot.lane.b32.xlu0 %v3066_v8, %s2695_s22 }
 0xe9b   :  { %1623 = vadd.xlane.f32.xlu1 %v1622_v39 }
 0xeac   :  { %1630 = vrot.lane.b32.xlu1 %v3066_v8, %s3286_s6 }
 0xedd   :  { %v1224_v42 = vpop.xlane.xlu0 %1223 }
 0xedf   :  { %v1227_v40 = vpop.xlane.xlu1 %1226 }
 0xee0   :  { %2559 = vrcp.f32 %v1227_v40 }
 0xee1   :  { %2561 = vrcp.f32 %v1224_v42 }
 0xee5   :  { %v1351_v43 = vpop.xlane.xlu0 %1350 }
 0xee9   :  { %v1354_v44 = vpop.xlane.xlu1 %1353 }
 0xeea   :  { %2563 = vrcp.f32 %v1354_v44  ;;  %v2560_v46 = vpop.eup %2559 }
 0xeeb   :  { %2565 = vrcp.f32 %v1351_v43  ;;  %v2562_v48 = vpop.eup %2561  ;;  %v1231_v49 = vmul.f32 %v2560_v46, %v2546_v16 }
 0xeec   :  { %v1230_v51 = vmul.f32 %v2562_v48, %v2544_v12 }
 0xeed   :  { %v1486_v45 = vpop.xlane.xlu0 %1485 }
 0xeee   :  { %v1232_v53 = vpack.c.bf16 %v1231_v49, %v1230_v51 }
 0xeef   :  { %v1489_v50 = vpop.xlane.xlu1 %1488 }
 0xef0   :  { %2567 = vrcp.f32 %v1489_v50 }
 0xef1   :  { %2569 = vrcp.f32 %v1486_v45 }
 0xef3   :  { %v1361_v55 = vpop.permute.xlu1 %1360 }
 0xef4   :  { %v2564_v8 = vpop.eup %2563 }
 0xef5   :  { %v1621_v47 = vpop.xlane.xlu0 %1620  ;;  %v2566_v56 = vpop.eup %2565  ;;  %v1358_v57 = vmul.f32 %v2564_v8, %v2550_v26 }
 0xef6   :  { %v1357_v59 = vmul.f32 %v2566_v56, %v2548_v23  ;;  %2571 = vrcp.f32 %v1621_v47 }
 0xef7   :  { %v1496_v0 = vpop.permute.xlu1 %1495 }
 0xef8   :  { %v1359_v60 = vpack.c.bf16 %v1358_v57, %v1357_v59 }
 0xef9   :  { %v1234_v52 = vpop.permute.xlu0 %1233 }
 0xefa   :  { %2374 = vmatpush3.bf16.msra.mxu1 %v1234_v52  ;;  %v2568_v61 = vpop.eup %2567 }
 0xefb   :  { %2385 = vmatprep.subr.bf16.mxu1 %v2686_v15  ;;  %v2570_v1 = vpop.eup %2569  ;;  %v1493_v2 = vmul.f32 %v2568_v61, %v2554_v33 }
 0xefc   :  { %v1492_v3 = vmul.f32 %v2570_v1, %v2552_v29 }
 0xefd   :  { %2376 = vmatmul.mubr.msk.bf16.vlgmr.msra.gmra.mrb[28].mxu1 %vm271_vm3, %v1232_v53 }
 0xefe   :  { %2386 = vmatpush3.bf16.msra.mxu1 %v1361_v55  ;;  %2387 = vmatprep.mubr.msk.bf16.mxu1 %vm2687_vm1, %v2686_v15  ;;  %v1494_v4 = vpack.c.bf16 %v1493_v2, %v1492_v3 }
 0xeff   :  { %2397 = vmatprep.subr.bf16.mxu1 %v2686_v15 }
 0xf00   :  { %v2572_v7 = vpop.eup %2571 }
 0xf01   :  { %v1627_v10 = vmul.f32 %v2572_v7, %v3125_v31  ;;  %v2181_v7 = vld [vmem:[%s3262_s9 + $0x1] ss:$0 sm:$0xff] }
 0xf05   :  { %2388 = vmatmul.mubr.msk.bf16.vlgmr.msra.gmra.mrb[32].mxu1 %vm271_vm3, %v1359_v60  ;;  %v2490_v60 = vld [vmem:[%s3264_s11 + $0x18] sm:$0xff]  }
 0xf06   :  { %2398 = vmatpush3.bf16.msra.mxu1 %v1496_v0  ;;  %2399 = vmatprep.mubr.msk.bf16.mxu1 %vm2687_vm1, %v2686_v15 }
 0xf07   :  { %2409 = vmatprep.subr.bf16.mxu1 %v2686_v15 }
 0xf0d   :  { %2400 = vmatmul.mubr.msk.bf16.vlgmr.msra.gmra.mrb[36].mxu1 %vm271_vm3, %v1494_v4 }
 0xf0e   :  { %2411 = vmatprep.mubr.msk.bf16.mxu1 %vm2687_vm1, %v2686_v15 }
 0xf28   :  { %v1624_v5 = vpop.xlane.xlu1 %1623 }
 0xf29   :  { %2573 = vrcp.f32 %v1624_v5 }
 0xf2c   :  { %v1631_v6 = vpop.permute.xlu1 %1630 }
 0xf2d   :  { %2410 = vmatpush3.bf16.msra.mxu1 %v1631_v6 }
 0xf2e   :  { %2423 = vmatprep.subr.bf16.mxu1 %v2686_v15 }
 0xf33   :  { %v2574_v9 = vpop.eup %2573 }
 0xf34   :  { %v1628_v54 = vmul.f32 %v2574_v9, %v2558_v38  ;;  %v2175_v38 = vld [vmem:[%s3261_s8 + $0x1] ss:$0 sm:$0xff] }
 0xf36   :  { %v1629_v11 = vpack.c.bf16 %v1628_v54, %v1627_v10 }
 0xf38   :  { %2412 = vmatmul.mubr.msk.bf16.vlgmr.msra.gmra.mrb[40].mxu1 %vm271_vm3, %v1629_v11  ;;  %v2182_v11 = vld [vmem:[%s3263_s10 + $0x1] ss:$0 sm:$0xff] }
 0xf39   :  { %2427 = vmatprep.mubr.msk.bf16.mxu1 %vm2687_vm1, %v2686_v15 }
 0xfd0   :  { %v1273_v12 = vpop.f32.mrb[28].mxu1 }
 0xfd1   :  { %1280 = vst.msk [vmem:[#allocation2] sm:$0xff] %vm219_vm2, %v1273_v12  ;;  %v2377_v58 = vpop.f32.mrb[29].mxu1 }
 0xfd2   :  { %v1276_v13 = vpop.f32.mrb[30].mxu1 }
 0xfd3   :  { %1281 = vst.msk [vmem:[#allocation2 + $0x8] sm:$0xff] %vm219_vm2, %v1276_v13  ;;  %v2378_v14 = vpop.f32.mrb[31].mxu1 }
 0xfd8   :  { %v1400_v16 = vpop.f32.mrb[32].mxu1 }
 0xfd9   :  { %1409 = vrot.lane.b32.xlu0 %v1400_v16, %s3287_s3  ;;  %v2389_v17 = vpop.f32.mrb[33].mxu1  ;;  %v2491_v16 = vld [vmem:[%s3266_s13 + $0x20] sm:$0xff]  }
 0xfda   :  { %v1403_v18 = vpop.f32.mrb[34].mxu1  ;;  %v2492_v17 = vld [vmem:[%s3266_s13 + $0x28] sm:$0xff]  }
 0xfdb   :  { %1411 = vrot.lane.b32.xlu1 %v1403_v18, %s3287_s3  ;;  %v2390_v19 = vpop.f32.mrb[35].mxu1  ;;  %v2493_v18 = vld [vmem:[%s3266_s13 + $0x30] sm:$0xff]  }
 0xfdc   :  { %v2494_v19 = vld [vmem:[%s3266_s13 + $0x38] sm:$0xff]  }
 0xfe0   :  { %v1535_v20 = vpop.f32.mrb[36].mxu1 }
 0xfe1   :  { %1544 = vrot.lane.b32.xlu0 %v1535_v20, %s3288_s19  ;;  %v2401_v21 = vpop.f32.mrb[37].mxu1  ;;  %v2188_v20 = vld [vmem:[%s3265_s12 + $0x1] ss:$0 sm:$0xff] }
 0xfe2   :  { %v1538_v22 = vpop.f32.mrb[38].mxu1 }
 0xfe3   :  { %1546 = vrot.lane.b32.xlu1 %v1538_v22, %s3288_s19  ;;  %v2402_v23 = vpop.f32.mrb[39].mxu1 }
0x100b   :  { %v1670_v25 = vpop.f32.mrb[40].mxu1 }
0x100c   :  { %1679 = vrot.lane.b32.xlu0 %v1670_v25, %s3289_s27  ;;  %v2413_v26 = vpop.f32.mrb[41].mxu1 }
0x100d   :  { %v1673_v27 = vpop.f32.mrb[42].mxu1 }
0x100e   :  { %1681 = vrot.lane.b32.xlu1 %v1673_v27, %s3289_s27  ;;  %v2414_v28 = vpop.f32.mrb[43].mxu1 }
0x104b   :  { %v1410_v29 = vpop.permute.xlu0 %1409 }
0x104c   :  { %1415 = vst.msk [vmem:[#allocation2] sm:$0xff] %vm477_vm4, %v1410_v29 }
0x104d   :  { %v1412_v30 = vpop.permute.xlu1 %1411 }
0x104e   :  { %1416 = vst.msk [vmem:[#allocation2 + $0x8] sm:$0xff] %vm477_vm4, %v1412_v30 }
0x1053   :  { %v1545_v33 = vpop.permute.xlu0 %1544 }
0x1054   :  { %1550 = vst.msk [vmem:[#allocation2] sm:$0xff] %vm613_vm5, %v1545_v33 }
0x1055   :  { %v1547_v34 = vpop.permute.xlu1 %1546 }
0x1056   :  { %1551 = vst.msk [vmem:[#allocation2 + $0x8] sm:$0xff] %vm613_vm5, %v1547_v34 }
0x107e   :  { %v1680_v31 = vpop.permute.xlu0 %1679 }
0x107f   :  { %1685 = vst.msk [vmem:[#allocation2] sm:$0xff] %vm749_vm6, %v1680_v31 }
0x1080   :  { %v1682_v32 = vpop.permute.xlu1 %1681 }
0x1081   :  { %1686 = vst.msk [vmem:[#allocation2 + $0x8] sm:$0xff] %vm749_vm6, %v1682_v32 }
0x1086   :  { %v1687_v35 = vld [vmem:[#allocation2] sm:$0xff] }
0x1088   :  { %v1688_v36 = vld [vmem:[#allocation2 + $0x8] sm:$0xff] }
0x1089   :  { %v1689_v37 = vpack.c.bf16 %v1688_v36, %v1687_v35 }
0x108b   :  { %2420 = vmatmul.mubr.msk.bf16.vlgmr.msra.gmra.mrb[40].mxu0 %vm101_vm0, %v1689_v37 }
0x108c   :  { %2439 = vmatprep.mubr.msk.bf16.mxu0 %vm2687_vm1, %v2686_v15  ;;  %2432 = vmatpush3.bf16.msra.mxu0 %v2491_v16  ;;  %v2210_v16 = vld [vmem:[%s3269_s16 + $0x1] ss:$0 sm:$0xff] }
0x108d   :  { %2433 = vmatprep.subr.bf16.mxu0 %v2686_v15 }
0x1090   :  { %2434 = vmatpush3.bf16.msra.mxu0 %v2492_v17 }
0x1091   :  { %2435 = vmatprep.subr.bf16.mxu0 %v2686_v15 }
0x1094   :  { %2436 = vmatpush3.bf16.msra.mxu0 %v2493_v18 }
0x1095   :  { %2437 = vmatprep.subr.bf16.mxu0 %v2686_v15 }
0x1098   :  { %2438 = vmatpush3.bf16.msra.mxu0 %v2494_v19 }
0x115e   :  { %v1752_v39 = vpop.f32.mrb[40].mxu0 }
0x115f   :  { %v1753_v40 = vadd.f32 %v2175_v38, %v1752_v39  ;;  %v2421_v42 = vpop.f32.mrb[41].mxu0 }
0x1160   :  { %v1755_v43 = vpop.f32.mrb[42].mxu0 }
0x1161   :  { %v1756_v44 = vadd.f32 %v2175_v38, %v1755_v43  ;;  %v2422_v45 = vpop.f32.mrb[43].mxu0  ;;  %v1759_v46 = vadd.f32 %v1753_v40, %v3054_v62 }
0x1163   :  { %v1765_v47 = vsel %vm101_vm0, %v1759_v46, 0.0  ;;  %v1760_v48 = vadd.f32 %v1756_v44, %v3056_v63  ;;  %v2489_v63 = vld [vmem:[%s3264_s11 + $0x10] sm:$0xff]  }
0x1164   :  { %1766 = vadd.xlane.f32.xlu0 %v1765_v47  ;;  %2424 = vmatpush3.bf16.msra.mxu1 %v2489_v63 }
0x1165   :  { %v1768_v49 = vsel %vm101_vm0, %v1760_v48, 0.0  ;;  %2425 = vmatprep.subr.bf16.mxu1 %v2686_v15 }
0x1166   :  { %1769 = vadd.xlane.f32.xlu1 %v1768_v49 }
0x1168   :  { %2426 = vmatpush3.bf16.msra.mxu1 %v2490_v60 }
0x11f1   :  { %v1767_v50 = vpop.xlane.xlu0 %1766 }
0x11f2   :  { %v1771_v51 = vmul.f32 0.03125, %v1767_v50 }
0x11f3   :  { %v1770_v52 = vpop.xlane.xlu1 %1769 }
0x11f4   :  { %v1773_v53 = vsub.f32 %v1759_v46, %v1771_v51  ;;  %v1772_v8 = vmul.f32 0.03125, %v1770_v52  ;;  %v2201_v46 = vld [vmem:[%s3267_s14 + $0x1] ss:$0 sm:$0xff] }
0x11f6   :  { %v1774_v55 = vsub.f32 %v1760_v48, %v1772_v8  ;;  %v1775_v56 = vmul.f32 %v1773_v53, %v1773_v53 }
0x11f8   :  { %v1777_v57 = vsel %vm101_vm0, %v1775_v56, 0.0  ;;  %v1776_v59 = vmul.f32 %v1774_v55, %v1774_v55 }
0x11f9   :  { %1778 = vadd.xlane.f32.xlu0 %v1777_v57 }
0x11fa   :  { %v1780_v62 = vsel %vm101_vm0, %v1776_v59, 0.0 }
0x11fd   :  { %1781 = vadd.xlane.f32.xlu0 %v1780_v62 }
0x1286   :  { %v1779_v61 = vpop.xlane.xlu0 %1778 }
0x1287   :  { %v1783_v0 = vmul.f32 0.03125, %v1779_v61 }
0x1289   :  { %v1785_v1 = vadd.f32 1e-12, %v1783_v0 }
0x128a   :  { %v1782_v2 = vpop.xlane.xlu0 %1781 }
0x128b   :  { %2575 = vrsqrt.f32 %v1785_v1  ;;  %v1784_v3 = vmul.f32 0.03125, %v1782_v2 }
0x128d   :  { %v1786_v4 = vadd.f32 1e-12, %v1784_v3  ;;  %v2701_v3 = vmov 0.0|0.0  }
0x128e   :  { %2450 = vmatprep.subr.bf16.mxu0 %v2701_v3 }
0x128f   :  { %2577 = vrsqrt.f32 %v1786_v4 }
0x1295   :  { %v2576_v5 = vpop.eup %2575 }
0x1296   :  { %v1789_v6 = vmul.f32 %v2576_v5, %v1773_v53 }
0x1298   :  { %v1797_v10 = vmul.f32 %v2181_v7, %v1789_v6 }
0x1299   :  { %v2578_v9 = vpop.eup %2577 }
0x129a   :  { %v1790_v54 = vmul.f32 %v2578_v9, %v1774_v55  ;;  %v1805_v58 = vadd.f32 %v2182_v11, %v1797_v10 }
0x129c   :  { %v1798_v12 = vmul.f32 %v2181_v7, %v1790_v54 }
0x129e   :  { %v1806_v13 = vadd.f32 %v2182_v11, %v1798_v12  ;;  %v2209_v11 = vld [vmem:[%s3268_s15 + $0x1] ss:$0 sm:$0xff]  ;;  %s2702_s15 = smov [#allocation9]  }
0x129f   :  { %s2111_s7 = sshll.u32 %s2702_s15, 4  ;;  %s2112_s7 = int_to_ptr.vmem [resolvable:$true] %s2111_s7 }
0x12a0   :  { %v1807_v14 = vpack.c.bf16 %v1806_v13, %v1805_v58  ;;  %s2653_s22 = scalar_lea.vmem %s2112_s7, 32  ;;  %p2658_p11 = scmp.lt.s32.totalorder %s2112_s7, %s2112_s7 }
0x12a1   :  { %p2654_p10 = scmp.ne.s32.totalorder %s2112_s7, %s2653_s22  ;;  %p2659_p12 = scmp.lt.s32.totalorder %s2653_s22, %s2653_s22 }
0x12a2   :  { %2428 = vmatmul.mubr.msk.bf16.vlgmr.msra.gmra.mrb[44].mxu1 %vm101_vm0, %v1807_v14 }
0x12a3   :  { %p2660_p13 = por %p2659_p12, %p2658_p11 }
0x12a5   :  { %p2661_p0 = pnand %p2660_p13, %p2654_p10 }
0x1375   :  { %v1870_v21 = vpop.f32.mrb[44].mxu1 }
0x1376   :  { %v1871_v22 = vadd.f32 %v2188_v20, %v1870_v21  ;;  %v2429_v23 = vpop.f32.mrb[45].mxu1  ;;  %v2029_v21 = vld [vmem:[%s3255_s2] sm:$0x3] }
0x1377   :  { %v1873_v24 = vpop.f32.mrb[46].mxu1 }
0x1378   :  { %v1879_v41 = vmul.f32 0.044715, %v1871_v22  ;;  %v1874_v25 = vadd.f32 %v2188_v20, %v1873_v24  ;;  %v2430_v26 = vpop.f32.mrb[47].mxu1  ;;  %v1877_v39 = vmul.f32 0.5, %v1871_v22 }
0x137a   :  { %v1881_v27 = vmul.f32 %v1879_v41, %v1871_v22  ;;  %v1880_v28 = vmul.f32 0.044715, %v1874_v25  ;;  %v1878_v40 = vmul.f32 0.5, %v1874_v25 }
0x137c   :  { %v1883_v29 = vmul.f32 %v1881_v27, %v1871_v22  ;;  %v1882_v30 = vmul.f32 %v1880_v28, %v1874_v25 }
0x137e   :  { %v1885_v33 = vadd.f32 %v1883_v29, %v1871_v22  ;;  %v1884_v34 = vmul.f32 %v1882_v30, %v1874_v25 }
0x1380   :  { %v1887_v31 = vmul.f32 0.7978846, %v1885_v33  ;;  %v1886_v32 = vadd.f32 %v1884_v34, %v1874_v25 }
0x1382   :  { %2579 = vtanh.f32 %v1887_v31  ;;  %v1888_v35 = vmul.f32 0.7978846, %v1886_v32 }
0x1384   :  { %2581 = vtanh.f32 %v1888_v35 }
0x138c   :  { %v2580_v36 = vpop.eup %2579 }
0x138d   :  { %v1891_v37 = vadd.f32 1.0, %v2580_v36 }
0x138e   :  { %v2582_v38 = vpop.eup %2581 }
0x138f   :  { %v1892_v42 = vadd.f32 1.0, %v2582_v38  ;;  %v1893_v43 = vmul.f32 %v1891_v37, %v1877_v39 }
0x1391   :  { %v1894_v44 = vmul.f32 %v1892_v42, %v1878_v40 }
0x1393   :  { %v1895_v45 = vpack.c.bf16 %v1894_v44, %v1893_v43 }
0x1395   :  { %2440 = vmatmul.mubr.msk.bf16.vlgmr.msra.gmra.mrb[44].mxu0 %vm994_vm7, %v1895_v45 }
0x1396   :  { %2447 = vmatprep.mubr.msk.f32.mxu0 %vm2687_vm1, %v2686_v15 }
0x1468   :  { %v1974_v47 = vpop.f32.mrb[44].mxu0 }
0x1469   :  { %v1975_v48 = vadd.f32 %v2201_v46, %v1974_v47  ;;  %v2441_v49 = vpop.f32.mrb[45].mxu0 }
0x146a   :  { %v1977_v50 = vpop.f32.mrb[46].mxu0 }
0x146b   :  { %v1978_v51 = vadd.f32 %v2201_v46, %v1977_v50  ;;  %v2442_v52 = vpop.f32.mrb[47].mxu0  ;;  %v1981_v53 = vadd.f32 %v1975_v48, %v1805_v58 }
0x146d   :  { %v1987_v8 = vsel %vm101_vm0, %v1981_v53, 0.0  ;;  %v1982_v55 = vadd.f32 %v1978_v51, %v1806_v13 }
0x146e   :  { %1988 = vadd.xlane.f32.xlu0 %v1987_v8 }
0x146f   :  { %v1990_v56 = vsel %vm101_vm0, %v1982_v55, 0.0 }
0x1470   :  { %1991 = vadd.xlane.f32.xlu1 %v1990_v56 }
0x14fb   :  { %v1989_v57 = vpop.xlane.xlu0 %1988 }
0x14fc   :  { %v1993_v15 = vmul.f32 0.03125, %v1989_v57 }
0x14fd   :  { %v1992_v59 = vpop.xlane.xlu1 %1991 }
0x14fe   :  { %v1995_v62 = vsub.f32 %v1981_v53, %v1993_v15  ;;  %v1994_v63 = vmul.f32 0.03125, %v1992_v59 }
0x1500   :  { %v1996_v60 = vsub.f32 %v1982_v55, %v1994_v63  ;;  %v1997_v61 = vmul.f32 %v1995_v62, %v1995_v62 }
0x1502   :  { %v1999_v0 = vsel %vm101_vm0, %v1997_v61, 0.0  ;;  %v1998_v1 = vmul.f32 %v1996_v60, %v1996_v60 }
0x1503   :  { %2000 = vadd.xlane.f32.xlu0 %v1999_v0 }
0x1504   :  { %v2002_v2 = vsel %vm101_vm0, %v1998_v1, 0.0 }
0x1505   :  { %2003 = vadd.xlane.f32.xlu1 %v2002_v2 }
0x1590   :  { %v2001_v4 = vpop.xlane.xlu0 %2000 }
0x1591   :  { %v2005_v5 = vmul.f32 0.03125, %v2001_v4 }
0x1592   :  { %v2004_v6 = vpop.xlane.xlu1 %2003 }
0x1593   :  { %v2007_v7 = vadd.f32 1e-12, %v2005_v5  ;;  %v2006_v9 = vmul.f32 0.03125, %v2004_v6 }
0x1595   :  { %2583 = vrsqrt.f32 %v2007_v7  ;;  %v2008_v10 = vadd.f32 1e-12, %v2006_v9 }
0x1597   :  { %2585 = vrsqrt.f32 %v2008_v10 }
0x159f   :  { %v2584_v54 = vpop.eup %2583 }
0x15a0   :  { %v2011_v12 = vmul.f32 %v2584_v54, %v1995_v62 }
0x15a1   :  { %v2586_v58 = vpop.eup %2585 }
0x15a2   :  { %v2012_v13 = vmul.f32 %v2586_v58, %v1996_v60  ;;  %v2019_v14 = vmul.f32 %v2209_v11, %v2011_v12 }
0x15a4   :  { %v2020_v17 = vmul.f32 %v2209_v11, %v2012_v13  ;;  %v2027_v18 = vadd.f32 %v2210_v16, %v2019_v14 }
0x15a6   :  { %v2028_v19 = vadd.f32 %v2210_v16, %v2020_v17 }
0x15a8   :  { %v2451_v20 = vpack.c.bf16 %v2028_v19, %v2027_v18 }
0x15aa   :  { %2452 = vmatpush3.bf16.msra.mxu0 %v2451_v20 }
0x15ad   :  { %2448 = vmatmul.mubr.msk.f32.vlgmr.msra.gmra.mrb[48].mxu0 %vm271_vm3, %v2029_v21 }
0x1680   :  { %v2099_v22 = vpop.f32.mrb[48].mxu0 }
0x1681   :  { %v2449_v23 = vpop.f32.mrb[49].mxu0  ;;  %2104 = vst.msk [vmem:[#allocation9] sm:$0x3] %vm2103_vm8, %v2099_v22 }
0x1682   :  { %2664 = shalt.err (!%p2661_p0)
}
0x1683   :  { %s3290_s18 = sld [smem:[#allocation15_spill]] }
0x1689   :  { %s2665_s2 = scalar_lea.hbm %s3290_s18, 32 }
0x168a   :  { %p2666_p1 = scmp.ne.s32.totalorder %s3290_s18, %s2665_s2  ;;  %p2669_p2 = scmp.lt.u32.totalorder %s2665_s2, %s3290_s18 }
0x168c   :  { %p2671_p3 = pnand %p2669_p2, %p2666_p1 }
0x168e   :  { %2674 = shalt.err (!%p2671_p3)
}
0x168f   :  { %2114 = dma.vmem_to_hbm [thread:$0]  %s2112_s7, 32, %s3290_s18, [#allocation5]  }
0x1690   :  { %2679 = dma.done.wait [#allocation5], 32  }
0x1691   :  { %2680 = vsyncadd [#allocation5], 4294967264 }
0x1692   :  { %2118 = vsyncpa [#allocation4], 1 }
0x1693   :  { %2119 = vsyncpa [#allocation7], 1 }
0x1694   :  { %2120 = vsyncpa [#allocation5], 1 }

</bundles_post_ra>
